<compile_context>
chip_gen: v7x
topology: tpu7x:2x2x1
jax: 0.10.0
libtpu: 0.0.40
codegen_flags: <defaults>
</compile_context>

<pallas_src>
import functools

import jax
import jax.numpy as jnp
from jax.experimental import pallas as pl
from jax.experimental.pallas import tpu as pltpu


# ----------------------------------------------------------------------------
# Fused kernel: one grid step = (layer l, batch tile bt).  Layer axis is OUTER
# so the per-layer weight blocks are DMA'd once per layer.
# ----------------------------------------------------------------------------
def _fused_layers_kernel(clip_length, batch_tile, num_heads, eps,
                         seq0_ref,
                         wqkv_ref, wp_ref, bp_ref,
                         ln1w_ref, ln1b_ref, ln2w_ref, ln2b_ref,
                         fc1w_ref, fc1b_ref, fc2w_ref, fc2b_ref,
                         out_ref, act_ref):
    l = pl.program_id(0)
    bt = pl.program_id(1)
    num_layers = pl.num_programs(0)

    S = act_ref.shape[1]                 # seq = clip_length + prefix_length
    C = act_ref.shape[2]
    H = num_heads
    D = C // H
    P = out_ref.shape[1]                 # prefix_length
    base = bt * batch_tile

    # ---- layer 0: seed the activation carry from the initial sequence ----
    @pl.when(l == 0)
    def _seed():
        for b in range(batch_tile):
            act_ref[base + b] = seq0_ref[base + b]

    # ---- gather this batch tile's rows into one (M, C) f32 slab ----
    x = jnp.concatenate([act_ref[base + b] for b in range(batch_tile)], axis=0)

    def layer_norm(z, w_ref, b_ref):
        mu = jnp.mean(z, axis=-1, keepdims=True)
        zc = z - mu
        var = jnp.mean(zc * zc, axis=-1, keepdims=True)
        return zc * jax.lax.rsqrt(var + eps) * w_ref[...] + b_ref[...]

    # ---- LayerNorm 1 + fused qkv projection (single lane-dense matmul) ----
    xn = layer_norm(x, ln1w_ref, ln1b_ref).astype(jnp.bfloat16)
    qkv = jnp.dot(xn, wqkv_ref[...], preferred_element_type=jnp.float32)   # (M, 3C)
    # 1/sqrt(D) is already folded into the q columns of wqkv on the host.
    q = qkv[:, 0:C].astype(jnp.bfloat16)
    k = qkv[:, C:2 * C].astype(jnp.bfloat16)
    v = qkv[:, 2 * C:3 * C].astype(jnp.bfloat16)

    # ---- per-(batch element, head) attention ----
    # TODO(synk): for production shapes where D = C/H is not a multiple of 128
    # (e.g. C=768, H=8 -> D=96), zero-pad D for the logits / p@v matmuls to
    # avoid masked lane slices.
    attn_rows = []
    for b in range(batch_tile):
        r0 = b * S
        heads = []
        for h in range(H):
            c0 = h * D
            qh = q[r0:r0 + S, c0:c0 + D]
            kh = k[r0:r0 + S, c0:c0 + D]
            vh = v[r0:r0 + S, c0:c0 + D]
            logits = jax.lax.dot_general(qh, kh, (((1,), (1,)), ((), ())),
                                         preferred_element_type=jnp.float32)  # (S, S)
            logits = logits - jnp.max(logits, axis=-1, keepdims=True)
            p = jnp.exp(logits)
            p = p / jnp.sum(p, axis=-1, keepdims=True)                         # exact softmax
            heads.append(jnp.dot(p.astype(jnp.bfloat16), vh,
                                 preferred_element_type=jnp.float32))          # (S, D)
        # Lane-concat the heads -> (S, C): the head reduction of the output
        # projection then happens inside the MXU K=C contraction below.
        attn_rows.append(jnp.concatenate(heads, axis=-1))
    attn = jnp.concatenate(attn_rows, axis=0)                                  # (M, C)

    proj = jnp.dot(attn.astype(jnp.bfloat16), wp_ref[...],
                   preferred_element_type=jnp.float32) + bp_ref[...]
    x = x + proj                                                               # residual 1

    # ---- LayerNorm 2 + ReLU MLP (mlp_ratio=2.0, dropout=0 -> identity) ----
    xn2 = layer_norm(x, ln2w_ref, ln2b_ref).astype(jnp.bfloat16)
    h1 = jnp.maximum(
        jnp.dot(xn2, fc1w_ref[...], preferred_element_type=jnp.float32)
        + fc1b_ref[...], 0.0)
    mlp = (jnp.dot(h1.astype(jnp.bfloat16), fc2w_ref[...],
                   preferred_element_type=jnp.float32) + fc2b_ref[...])
    x = x + mlp                                                                # residual 2

    # ---- write back the carry; emit prefix rows only, on the last layer ----
    last = l == num_layers - 1
    for b in range(batch_tile):
        xb = x[b * S:(b + 1) * S, :]
        act_ref[base + b] = xb

        @pl.when(last)
        def _emit(xb=xb, b=b):
            out_ref[b] = xb[clip_length:clip_length + P, :]


# ----------------------------------------------------------------------------
# One-time host-side weight repacking (kept OUT of the per-call jit path).
# All weights are stored in (in_dim, out_dim) layout so every linear is
# y = x @ W + b.
# ----------------------------------------------------------------------------
def pack_transformer_mapper_params(params, *, num_heads):
    layers = params["layers"]
    c = params["prefix_const"].shape[-1]
    d = c // num_heads
    scale = float(d) ** -0.5

    def stack(fn, dtype):
        return jnp.stack([jnp.asarray(fn(lp)) for lp in layers]).astype(dtype)

    return {
        "w_map": jnp.asarray(params["w_map"], jnp.float32),
        "b_map": jnp.asarray(params["b_map"], jnp.float32),
        "prefix_const": jnp.asarray(params["prefix_const"], jnp.float32),
        # [ Wq * scale | Wk | Wv ]; head h occupies columns h*D:(h+1)*D of each block
        # (matches torch's reshape(..., heads, head_dim) / (..., 2, heads, head_dim)).
        "wqkv": stack(lambda lp: jnp.concatenate(
            [lp["wq"] * scale, lp["wkv"][:, :c], lp["wkv"][:, c:]], axis=1),
            jnp.bfloat16),                                           # (NL, C, 3C)
        "wp": stack(lambda lp: lp["wp"], jnp.bfloat16),              # (NL, C, C)
        "bp": stack(lambda lp: lp["bp"], jnp.float32),               # (NL, 1, C)
        "ln1w": stack(lambda lp: lp["ln1w"], jnp.float32),
        "ln1b": stack(lambda lp: lp["ln1b"], jnp.float32),
        "ln2w": stack(lambda lp: lp["ln2w"], jnp.float32),
        "ln2b": stack(lambda lp: lp["ln2b"], jnp.float32),
        "fc1w": stack(lambda lp: lp["fc1w"], jnp.bfloat16),          # (NL, C, 2C)
        "fc1b": stack(lambda lp: lp["fc1b"], jnp.float32),
        "fc2w": stack(lambda lp: lp["fc2w"], jnp.bfloat16),          # (NL, 2C, C)
        "fc2b": stack(lambda lp: lp["fc2b"], jnp.float32),
    }


# ----------------------------------------------------------------------------
# Jitted forward: mapper linear + prefix concat in XLA, then one pallas_call
# for all transformer layers.
# ----------------------------------------------------------------------------
@functools.partial(jax.jit, static_argnames=("clip_length", "num_heads", "batch_tile"))
def transformer_mapper_forward(x, packed, *, clip_length, num_heads, batch_tile=None):
    prefix_const = packed["prefix_const"]
    P, C = prefix_const.shape
    dim_clip = packed["w_map"].shape[0]
    if x.shape[-1] != dim_clip:
        x = x.reshape(-1, dim_clip)
    B = x.shape[0]
    S = clip_length + P
    NL = packed["wqkv"].shape[0]

    # Default: whole batch per tile -> layer weights streamed exactly once per
    # layer.  For large B (or to shard the batch across v7x's two TensorCores
    # outside this call) pick a divisor of B.
    B_tile = B if batch_tile is None else batch_tile
    assert B % B_tile == 0 and C % num_heads == 0
    nb = B // B_tile

    # Mapper linear + prefix concat: tiny, stays in XLA (frees kernel VMEM/XLU).
    mapped = (x.astype(jnp.float32) @ packed["w_map"]
              + packed["b_map"]).reshape(B, clip_length, C)
    seq0 = jnp.concatenate(
        [mapped, jnp.broadcast_to(prefix_const[None], (B, P, C))], axis=1)  # (B, S, C)

    kern = functools.partial(_fused_layers_kernel, clip_length, B_tile, num_heads, 1e-5)

    def layer_spec(a):
        nd = a.ndim
        return pl.BlockSpec((None,) + a.shape[1:],
                            lambda l, bt, _nd=nd: (l,) + (0,) * (_nd - 1))

    in_specs = [
        # Initial sequence: one full block, constant index -> single DMA, resident.
        pl.BlockSpec(seq0.shape, lambda l, bt: (0, 0, 0)),
        layer_spec(packed["wqkv"]), layer_spec(packed["wp"]), layer_spec(packed["bp"]),
        layer_spec(packed["ln1w"]), layer_spec(packed["ln1b"]),
        layer_spec(packed["ln2w"]), layer_spec(packed["ln2b"]),
        layer_spec(packed["fc1w"]), layer_spec(packed["fc1b"]),
        layer_spec(packed["fc2w"]), layer_spec(packed["fc2b"]),
    ]
    out_specs = pl.BlockSpec((B_tile, P, C), lambda l, bt: (bt, 0, 0))

    # VMEM budget: double-buffered per-layer weight blocks + resident seq0 /
    # activation scratch / output blocks + in-kernel working set.  Capped at
    # 48 MiB to leave headroom under v7x's 64 MiB per-TensorCore VMEM; floored
    # at 32 MiB (the default scoped limit) so we never shrink pipelining.
    layer_tensors = [packed[kk] for kk in ("wqkv", "wp", "bp", "ln1w", "ln1b",
                                           "ln2w", "ln2b", "fc1w", "fc1b",
                                           "fc2w", "fc2b")]
    per_layer = sum((t.size // NL) * t.dtype.itemsize for t in layer_tensors)
    resident = seq0.size * 4 + B * S * C * 4 + 2 * B_tile * P * C * 4
    M = B_tile * S
    work = (3 * M * 3 * C + 4 * M * C + 2 * B_tile * num_heads * S * S
            + 2 * M * 2 * C) * 4
    vmem_limit = int(min(48 * 2**20,
                         max(32 * 2**20, 2 * per_layer + resident + work + (2 << 20))))

    out = pl.pallas_call(
        kern,
        out_shape=jax.ShapeDtypeStruct((B, P, C), jnp.float32),
        grid=(NL, nb),
        in_specs=in_specs,
        out_specs=out_specs,
        scratch_shapes=[pltpu.VMEM((B, S, C), jnp.float32)],   # layer-carried activations
        compiler_params=pltpu.CompilerParams(
            # Layer axis carries the activations (sequential); the batch-tile
            # axis shares the full-batch scratch, so it is also "arbitrary".
            dimension_semantics=("arbitrary", "arbitrary"),
            vmem_limit_bytes=vmem_limit),
    )(seq0, packed["wqkv"], packed["wp"], packed["bp"],
      packed["ln1w"], packed["ln1b"], packed["ln2w"], packed["ln2b"],
      packed["fc1w"], packed["fc1b"], packed["fc2w"], packed["fc2b"])
    return out


# ----------------------------------------------------------------------------
# Pure-JAX f32 reference mirroring the PyTorch module (for a sanity check).
# ----------------------------------------------------------------------------
def reference_forward(x, params, *, clip_length, num_heads):
    prefix_const = jnp.asarray(params["prefix_const"], jnp.float32)
    P, C = prefix_const.shape
    H = num_heads
    D = C // H
    eps = 1e-5
    dim_clip = params["w_map"].shape[0]
    if x.shape[-1] != dim_clip:
        x = x.reshape(-1, dim_clip)
    B = x.shape[0]

    def ln(z, w, b):
        mu = jnp.mean(z, axis=-1, keepdims=True)
        var = jnp.mean((z - mu) ** 2, axis=-1, keepdims=True)
        return (z - mu) / jnp.sqrt(var + eps) * w + b

    t = (x @ params["w_map"] + params["b_map"]).reshape(B, clip_length, C)
    h = jnp.concatenate([t, jnp.broadcast_to(prefix_const[None], (B, P, C))], axis=1)
    scale = float(D) ** -0.5
    for lp in params["layers"]:
        xn = ln(h, lp["ln1w"], lp["ln1b"])
        q = (xn @ lp["wq"]).reshape(B, -1, H, D)
        kv = xn @ lp["wkv"]
        k = kv[..., :C].reshape(B, -1, H, D)
        v = kv[..., C:].reshape(B, -1, H, D)
        att = jnp.einsum("bnhd,bmhd->bnmh", q, k) * scale
        att = jax.nn.softmax(att, axis=2)
        o = jnp.einsum("bnmh,bmhd->bnhd", att, v).reshape(B, -1, C)
        h = h + o @ lp["wp"] + lp["bp"]
        xn2 = ln(h, lp["ln2w"], lp["ln2b"])
        h = h + jnp.maximum(xn2 @ lp["fc1w"] + lp["fc1b"], 0.0) @ lp["fc2w"] + lp["fc2b"]
    return h[:, clip_length:]


# ----------------------------------------------------------------------------
if __name__ == "__main__":
    # Small shapes consistent with the module's forward.
    B = 2
    dim_clip = 16
    dim_embedding = 32          # must be divisible by num_heads=8
    clip_length = 4
    prefix_length = 8
    num_layers = 2              # module default is 8; kept small for the demo
    num_heads = 8

    key = jax.random.PRNGKey(0)
    keys = iter(jax.random.split(key, 64))

    def rnd(shape, scale=0.05):
        return (scale * jax.random.normal(next(keys), shape)).astype(jnp.float32)

    x = jax.random.normal(next(keys), (B, dim_clip), dtype=jnp.float32)

    c = dim_embedding
    params = {
        # TransformerMapper.linear : dim_clip -> clip_length * dim_embedding
        "w_map": rnd((dim_clip, clip_length * c)),
        "b_map": rnd((1, clip_length * c)),
        # prefix_const ~ N(0, 1) as in torch.randn
        "prefix_const": jax.random.normal(
            next(keys), (prefix_length, c), dtype=jnp.float32),
        "layers": [],
    }
    for _ in range(num_layers):
        params["layers"].append(dict(
            wq=rnd((c, c)),                    # to_queries (bias=False)
            wkv=rnd((c, 2 * c)),               # to_keys_values (bias=False): [keys | values]
            wp=rnd((c, c)), bp=rnd((1, c)),    # project (bias=True)
            ln1w=jnp.ones((1, c), jnp.float32), ln1b=jnp.zeros((1, c), jnp.float32),
            ln2w=jnp.ones((1, c), jnp.float32), ln2b=jnp.zeros((1, c), jnp.float32),
            fc1w=rnd((c, 2 * c)), fc1b=rnd((1, 2 * c)),   # mlp_ratio = 2.0
            fc2w=rnd((2 * c, c)), fc2b=rnd((1, c)),
        ))

    packed = pack_transformer_mapper_params(params, num_heads=num_heads)
    out = transformer_mapper_forward(
        x, packed, clip_length=clip_length, num_heads=num_heads)
    out = jax.block_until_ready(out)

    assert out.shape == (B, prefix_length, dim_embedding), out.shape
    assert bool(jnp.all(jnp.isfinite(out)))

    ref = reference_forward(x, params, clip_length=clip_length, num_heads=num_heads)
    err = float(jnp.max(jnp.abs(out - ref)))
    assert err < 5e-2, f"max abs err vs reference: {err}"
    print("KERNEL_OK")
</pallas_src>

<mosaic_0001>
module attributes {stable_mosaic.version = 11 : i64} {
  func.func @_fused_layers_kernel(%arg0: i32, %arg1: i32, %arg2: memref<2x12x32xf32, #tpu.memory_space<vmem>>, %arg3: memref<1x32x96xbf16, #tpu.memory_space<vmem>>, %arg4: memref<1x32x32xbf16, #tpu.memory_space<vmem>>, %arg5: memref<1x1x32xf32, #tpu.memory_space<vmem>>, %arg6: memref<1x1x32xf32, #tpu.memory_space<vmem>>, %arg7: memref<1x1x32xf32, #tpu.memory_space<vmem>>, %arg8: memref<1x1x32xf32, #tpu.memory_space<vmem>>, %arg9: memref<1x1x32xf32, #tpu.memory_space<vmem>>, %arg10: memref<1x32x64xbf16, #tpu.memory_space<vmem>>, %arg11: memref<1x1x64xf32, #tpu.memory_space<vmem>>, %arg12: memref<1x64x32xbf16, #tpu.memory_space<vmem>>, %arg13: memref<1x1x32xf32, #tpu.memory_space<vmem>>, %arg14: memref<2x8x32xf32, #tpu.memory_space<vmem>>, %arg15: memref<2x12x32xf32, #tpu.memory_space<vmem>>) attributes {dimension_semantics = [#tpu.dimension_semantics<arbitrary>, #tpu.dimension_semantics<arbitrary>], iteration_bounds = array<i64: 2, 1>, scalar_prefetch = 0 : i64, scratch_operands = 1 : i64, tpu.core_type = #tpu.core_type<tc>, window_params = [{pipeline_mode = #tpu.pipeline_mode<synchronous>, transform_indices = @transform_0, window_bounds = array<i64: 2, 12, 32>}, {transform_indices = @transform_1, window_bounds = array<i64: 1, 32, 96>}, {transform_indices = @transform_2, window_bounds = array<i64: 1, 32, 32>}, {transform_indices = @transform_3, window_bounds = array<i64: 1, 1, 32>}, {transform_indices = @transform_4, window_bounds = array<i64: 1, 1, 32>}, {transform_indices = @transform_5, window_bounds = array<i64: 1, 1, 32>}, {transform_indices = @transform_6, window_bounds = array<i64: 1, 1, 32>}, {transform_indices = @transform_7, window_bounds = array<i64: 1, 1, 32>}, {transform_indices = @transform_8, window_bounds = array<i64: 1, 32, 64>}, {transform_indices = @transform_9, window_bounds = array<i64: 1, 1, 64>}, {transform_indices = @transform_10, window_bounds = array<i64: 1, 64, 32>}, {transform_indices = @transform_11, window_bounds = array<i64: 1, 1, 32>}, {transform_indices = @transform_12, window_bounds = array<i64: 2, 8, 32>}]} {
    %c2_i32 = arith.constant 2 : i32
    %0 = arith.muli %arg1, %c2_i32 : i32
    %c0_i32 = arith.constant 0 : i32
    %1 = arith.cmpi eq, %arg0, %c0_i32 : i32
    %2 = arith.extui %1 : i1 to i32
    %c0_i32_0 = arith.constant 0 : i32
    %3 = arith.cmpi ne, %2, %c0_i32_0 : i32
    scf.if %3 {
      %c0_i32_125 = arith.constant 0 : i32
      %359 = arith.addi %0, %c0_i32_125 : i32
      %360 = arith.index_cast %359 : i32 to index
      %c0_126 = arith.constant 0 : index
      %c0_127 = arith.constant 0 : index
      %361 = vector.load %arg2[%360, %c0_126, %c0_127] : memref<2x12x32xf32, #tpu.memory_space<vmem>>, vector<1x12x32xf32>
      %362 = vector.shape_cast %361 : vector<1x12x32xf32> to vector<12x32xf32>
      %c0_i32_128 = arith.constant 0 : i32
      %363 = arith.addi %0, %c0_i32_128 : i32
      %364 = arith.index_cast %363 : i32 to index
      %c0_129 = arith.constant 0 : index
      %c0_130 = arith.constant 0 : index
      %365 = vector.load %arg15[%364, %c0_129, %c0_130] : memref<2x12x32xf32, #tpu.memory_space<vmem>>, vector<1x12x32xf32>
      %366 = vector.shape_cast %365 : vector<1x12x32xf32> to vector<12x32xf32>
      %367 = vector.shape_cast %362 : vector<12x32xf32> to vector<1x12x32xf32>
      tpu.vector_store %arg15[%364, %c0_129, %c0_130], %367 {strides = array<i32>} : memref<2x12x32xf32, #tpu.memory_space<vmem>>, vector<1x12x32xf32>,
      %c1_i32_131 = arith.constant 1 : i32
      %368 = arith.addi %0, %c1_i32_131 : i32
      %369 = arith.index_cast %368 : i32 to index
      %c0_132 = arith.constant 0 : index
      %c0_133 = arith.constant 0 : index
      %370 = vector.load %arg2[%369, %c0_132, %c0_133] : memref<2x12x32xf32, #tpu.memory_space<vmem>>, vector<1x12x32xf32>
      %371 = vector.shape_cast %370 : vector<1x12x32xf32> to vector<12x32xf32>
      %c1_i32_134 = arith.constant 1 : i32
      %372 = arith.addi %0, %c1_i32_134 : i32
      %373 = arith.index_cast %372 : i32 to index
      %c0_135 = arith.constant 0 : index
      %c0_136 = arith.constant 0 : index
      %374 = vector.load %arg15[%373, %c0_135, %c0_136] : memref<2x12x32xf32, #tpu.memory_space<vmem>>, vector<1x12x32xf32>
      %375 = vector.shape_cast %374 : vector<1x12x32xf32> to vector<12x32xf32>
      %376 = vector.shape_cast %371 : vector<12x32xf32> to vector<1x12x32xf32>
      tpu.vector_store %arg15[%373, %c0_135, %c0_136], %376 {strides = array<i32>} : memref<2x12x32xf32, #tpu.memory_space<vmem>>, vector<1x12x32xf32>,
    } else {
    }
    %c0_i32_1 = arith.constant 0 : i32
    %4 = arith.addi %0, %c0_i32_1 : i32
    %5 = arith.index_cast %4 : i32 to index
    %c0 = arith.constant 0 : index
    %c0_2 = arith.constant 0 : index
    %6 = vector.load %arg15[%5, %c0, %c0_2] : memref<2x12x32xf32, #tpu.memory_space<vmem>>, vector<1x12x32xf32>
    %7 = vector.shape_cast %6 : vector<1x12x32xf32> to vector<12x32xf32>
    %c1_i32 = arith.constant 1 : i32
    %8 = arith.addi %0, %c1_i32 : i32
    %9 = arith.index_cast %8 : i32 to index
    %c0_3 = arith.constant 0 : index
    %c0_4 = arith.constant 0 : index
    %10 = vector.load %arg15[%9, %c0_3, %c0_4] : memref<2x12x32xf32, #tpu.memory_space<vmem>>, vector<1x12x32xf32>
    %11 = vector.shape_cast %10 : vector<1x12x32xf32> to vector<12x32xf32>
    %12 = tpu.concatenate %7, %11 in 0 : vector<12x32xf32>, vector<12x32xf32> -> vector<24x32xf32>
    %cst = arith.constant dense<0.000000e+00> : vector<24xf32>
    %13 = vector.multi_reduction <add>, %12, %cst [1] : vector<24x32xf32> to vector<24xf32>
    %14 = vector.shape_cast %13 : vector<24xf32> to vector<24x1xf32>
    %cst_5 = arith.constant 3.200000e+01 : f32
    %15 = vector.broadcast %cst_5 : f32 to vector<24x1xf32>
    %16 = arith.divf %14, %15 : vector<24x1xf32>
    %17 = vector.broadcast %16 : vector<24x1xf32> to vector<24x32xf32>
    %18 = arith.subf %12, %17 : vector<24x32xf32>
    %19 = arith.mulf %18, %18 : vector<24x32xf32>
    %cst_6 = arith.constant dense<0.000000e+00> : vector<24xf32>
    %20 = vector.multi_reduction <add>, %19, %cst_6 [1] : vector<24x32xf32> to vector<24xf32>
    %21 = vector.shape_cast %20 : vector<24xf32> to vector<24x1xf32>
    %cst_7 = arith.constant 3.200000e+01 : f32
    %22 = vector.broadcast %cst_7 : f32 to vector<24x1xf32>
    %23 = arith.divf %21, %22 : vector<24x1xf32>
    %cst_8 = arith.constant 9.99999974E-6 : f32
    %24 = vector.broadcast %cst_8 : f32 to vector<24x1xf32>
    %25 = arith.addf %23, %24 : vector<24x1xf32>
    %26 = math.rsqrt %25 : vector<24x1xf32>
    %27 = vector.broadcast %26 : vector<24x1xf32> to vector<24x32xf32>
    %28 = arith.mulf %18, %27 : vector<24x32xf32>
    %c0_9 = arith.constant 0 : index
    %c0_10 = arith.constant 0 : index
    %c0_11 = arith.constant 0 : index
    %29 = vector.load %arg6[%c0_9, %c0_10, %c0_11] : memref<1x1x32xf32, #tpu.memory_space<vmem>>, vector<1x1x32xf32>
    %30 = vector.shape_cast %29 : vector<1x1x32xf32> to vector<1x32xf32>
    %31 = vector.broadcast %30 : vector<1x32xf32> to vector<24x32xf32>
    %32 = arith.mulf %28, %31 : vector<24x32xf32>
    %c0_12 = arith.constant 0 : index
    %c0_13 = arith.constant 0 : index
    %c0_14 = arith.constant 0 : index
    %33 = vector.load %arg7[%c0_12, %c0_13, %c0_14] : memref<1x1x32xf32, #tpu.memory_space<vmem>>, vector<1x1x32xf32>
    %34 = vector.shape_cast %33 : vector<1x1x32xf32> to vector<1x32xf32>
    %35 = vector.broadcast %34 : vector<1x32xf32> to vector<24x32xf32>
    %36 = arith.addf %32, %35 : vector<24x32xf32>
    %37 = arith.truncf %36 : vector<24x32xf32> to vector<24x32xbf16>
    %c0_15 = arith.constant 0 : index
    %c0_16 = arith.constant 0 : index
    %c0_17 = arith.constant 0 : index
    %38 = vector.load %arg3[%c0_15, %c0_16, %c0_17] : memref<1x32x96xbf16, #tpu.memory_space<vmem>>, vector<1x32x96xbf16>
    %39 = vector.shape_cast %38 : vector<1x32x96xbf16> to vector<32x96xbf16>
    %cst_18 = arith.constant dense<0.000000e+00> : vector<24x96xf32>
    %40 = tpu.matmul %37, %39, %cst_18 {dimension_numbers = #tpu.dot_dimension_numbers<[1], [0], [0], [1], [0, 0, 1, 1], [], []>} : vector<24x32xbf16>, vector<32x96xbf16>, vector<24x96xf32> -> vector<24x96xf32>
    %41 = vector.extract_strided_slice %40 {offsets = [0, 0], sizes = [24, 32], strides = [1, 1]} : vector<24x96xf32> to vector<24x32xf32>
    %42 = arith.truncf %41 : vector<24x32xf32> to vector<24x32xbf16>
    %43 = vector.extract_strided_slice %40 {offsets = [0, 32], sizes = [24, 32], strides = [1, 1]} : vector<24x96xf32> to vector<24x32xf32>
    %44 = arith.truncf %43 : vector<24x32xf32> to vector<24x32xbf16>
    %45 = vector.extract_strided_slice %40 {offsets = [0, 64], sizes = [24, 32], strides = [1, 1]} : vector<24x96xf32> to vector<24x32xf32>
    %46 = arith.truncf %45 : vector<24x32xf32> to vector<24x32xbf16>
    %47 = vector.extract_strided_slice %42 {offsets = [0, 0], sizes = [12, 4], strides = [1, 1]} : vector<24x32xbf16> to vector<12x4xbf16>
    %48 = vector.extract_strided_slice %44 {offsets = [0, 0], sizes = [12, 4], strides = [1, 1]} : vector<24x32xbf16> to vector<12x4xbf16>
    %49 = vector.extract_strided_slice %46 {offsets = [0, 0], sizes = [12, 4], strides = [1, 1]} : vector<24x32xbf16> to vector<12x4xbf16>
    %cst_19 = arith.constant dense<0.000000e+00> : vector<12x12xf32>
    %50 = tpu.matmul %47, %48, %cst_19 {dimension_numbers = #tpu.dot_dimension_numbers<[1], [1], [0], [0], [0, 0, 1, 0], [], []>} : vector<12x4xbf16>, vector<12x4xbf16>, vector<12x12xf32> -> vector<12x12xf32>
    %cst_20 = arith.constant dense<0xFF800000> : vector<12xf32>
    %51 = vector.multi_reduction <maximumf>, %50, %cst_20 [1] : vector<12x12xf32> to vector<12xf32>
    %52 = vector.shape_cast %51 : vector<12xf32> to vector<12x1xf32>
    %53 = vector.broadcast %52 : vector<12x1xf32> to vector<12x12xf32>
    %54 = arith.subf %50, %53 : vector<12x12xf32>
    %55 = math.exp %54 : vector<12x12xf32>
    %cst_21 = arith.constant dense<0.000000e+00> : vector<12xf32>
    %56 = vector.multi_reduction <add>, %55, %cst_21 [1] : vector<12x12xf32> to vector<12xf32>
    %57 = vector.shape_cast %56 : vector<12xf32> to vector<12x1xf32>
    %58 = vector.broadcast %57 : vector<12x1xf32> to vector<12x12xf32>
    %59 = arith.divf %55, %58 : vector<12x12xf32>
    %60 = arith.truncf %59 : vector<12x12xf32> to vector<12x12xbf16>
    %cst_22 = arith.constant dense<0.000000e+00> : vector<12x4xf32>
    %61 = tpu.matmul %60, %49, %cst_22 {dimension_numbers = #tpu.dot_dimension_numbers<[1], [0], [0], [1], [0, 0, 1, 1], [], []>} : vector<12x12xbf16>, vector<12x4xbf16>, vector<12x4xf32> -> vector<12x4xf32>
    %62 = vector.extract_strided_slice %42 {offsets = [0, 4], sizes = [12, 4], strides = [1, 1]} : vector<24x32xbf16> to vector<12x4xbf16>
    %63 = vector.extract_strided_slice %44 {offsets = [0, 4], sizes = [12, 4], strides = [1, 1]} : vector<24x32xbf16> to vector<12x4xbf16>
    %64 = vector.extract_strided_slice %46 {offsets = [0, 4], sizes = [12, 4], strides = [1, 1]} : vector<24x32xbf16> to vector<12x4xbf16>
    %cst_23 = arith.constant dense<0.000000e+00> : vector<12x12xf32>
    %65 = tpu.matmul %62, %63, %cst_23 {dimension_numbers = #tpu.dot_dimension_numbers<[1], [1], [0], [0], [0, 0, 1, 0], [], []>} : vector<12x4xbf16>, vector<12x4xbf16>, vector<12x12xf32> -> vector<12x12xf32>
    %cst_24 = arith.constant dense<0xFF800000> : vector<12xf32>
    %66 = vector.multi_reduction <maximumf>, %65, %cst_24 [1] : vector<12x12xf32> to vector<12xf32>
    %67 = vector.shape_cast %66 : vector<12xf32> to vector<12x1xf32>
    %68 = vector.broadcast %67 : vector<12x1xf32> to vector<12x12xf32>
    %69 = arith.subf %65, %68 : vector<12x12xf32>
    %70 = math.exp %69 : vector<12x12xf32>
    %cst_25 = arith.constant dense<0.000000e+00> : vector<12xf32>
    %71 = vector.multi_reduction <add>, %70, %cst_25 [1] : vector<12x12xf32> to vector<12xf32>
    %72 = vector.shape_cast %71 : vector<12xf32> to vector<12x1xf32>
    %73 = vector.broadcast %72 : vector<12x1xf32> to vector<12x12xf32>
    %74 = arith.divf %70, %73 : vector<12x12xf32>
    %75 = arith.truncf %74 : vector<12x12xf32> to vector<12x12xbf16>
    %cst_26 = arith.constant dense<0.000000e+00> : vector<12x4xf32>
    %76 = tpu.matmul %75, %64, %cst_26 {dimension_numbers = #tpu.dot_dimension_numbers<[1], [0], [0], [1], [0, 0, 1, 1], [], []>} : vector<12x12xbf16>, vector<12x4xbf16>, vector<12x4xf32> -> vector<12x4xf32>
    %77 = vector.extract_strided_slice %42 {offsets = [0, 8], sizes = [12, 4], strides = [1, 1]} : vector<24x32xbf16> to vector<12x4xbf16>
    %78 = vector.extract_strided_slice %44 {offsets = [0, 8], sizes = [12, 4], strides = [1, 1]} : vector<24x32xbf16> to vector<12x4xbf16>
    %79 = vector.extract_strided_slice %46 {offsets = [0, 8], sizes = [12, 4], strides = [1, 1]} : vector<24x32xbf16> to vector<12x4xbf16>
    %cst_27 = arith.constant dense<0.000000e+00> : vector<12x12xf32>
    %80 = tpu.matmul %77, %78, %cst_27 {dimension_numbers = #tpu.dot_dimension_numbers<[1], [1], [0], [0], [0, 0, 1, 0], [], []>} : vector<12x4xbf16>, vector<12x4xbf16>, vector<12x12xf32> -> vector<12x12xf32>
    %cst_28 = arith.constant dense<0xFF800000> : vector<12xf32>
    %81 = vector.multi_reduction <maximumf>, %80, %cst_28 [1] : vector<12x12xf32> to vector<12xf32>
    %82 = vector.shape_cast %81 : vector<12xf32> to vector<12x1xf32>
    %83 = vector.broadcast %82 : vector<12x1xf32> to vector<12x12xf32>
    %84 = arith.subf %80, %83 : vector<12x12xf32>
    %85 = math.exp %84 : vector<12x12xf32>
    %cst_29 = arith.constant dense<0.000000e+00> : vector<12xf32>
    %86 = vector.multi_reduction <add>, %85, %cst_29 [1] : vector<12x12xf32> to vector<12xf32>
    %87 = vector.shape_cast %86 : vector<12xf32> to vector<12x1xf32>
    %88 = vector.broadcast %87 : vector<12x1xf32> to vector<12x12xf32>
    %89 = arith.divf %85, %88 : vector<12x12xf32>
    %90 = arith.truncf %89 : vector<12x12xf32> to vector<12x12xbf16>
    %cst_30 = arith.constant dense<0.000000e+00> : vector<12x4xf32>
    %91 = tpu.matmul %90, %79, %cst_30 {dimension_numbers = #tpu.dot_dimension_numbers<[1], [0], [0], [1], [0, 0, 1, 1], [], []>} : vector<12x12xbf16>, vector<12x4xbf16>, vector<12x4xf32> -> vector<12x4xf32>
    %92 = vector.extract_strided_slice %42 {offsets = [0, 12], sizes = [12, 4], strides = [1, 1]} : vector<24x32xbf16> to vector<12x4xbf16>
    %93 = vector.extract_strided_slice %44 {offsets = [0, 12], sizes = [12, 4], strides = [1, 1]} : vector<24x32xbf16> to vector<12x4xbf16>
    %94 = vector.extract_strided_slice %46 {offsets = [0, 12], sizes = [12, 4], strides = [1, 1]} : vector<24x32xbf16> to vector<12x4xbf16>
    %cst_31 = arith.constant dense<0.000000e+00> : vector<12x12xf32>
    %95 = tpu.matmul %92, %93, %cst_31 {dimension_numbers = #tpu.dot_dimension_numbers<[1], [1], [0], [0], [0, 0, 1, 0], [], []>} : vector<12x4xbf16>, vector<12x4xbf16>, vector<12x12xf32> -> vector<12x12xf32>
    %cst_32 = arith.constant dense<0xFF800000> : vector<12xf32>
    %96 = vector.multi_reduction <maximumf>, %95, %cst_32 [1] : vector<12x12xf32> to vector<12xf32>
    %97 = vector.shape_cast %96 : vector<12xf32> to vector<12x1xf32>
    %98 = vector.broadcast %97 : vector<12x1xf32> to vector<12x12xf32>
    %99 = arith.subf %95, %98 : vector<12x12xf32>
    %100 = math.exp %99 : vector<12x12xf32>
    %cst_33 = arith.constant dense<0.000000e+00> : vector<12xf32>
    %101 = vector.multi_reduction <add>, %100, %cst_33 [1] : vector<12x12xf32> to vector<12xf32>
    %102 = vector.shape_cast %101 : vector<12xf32> to vector<12x1xf32>
    %103 = vector.broadcast %102 : vector<12x1xf32> to vector<12x12xf32>
    %104 = arith.divf %100, %103 : vector<12x12xf32>
    %105 = arith.truncf %104 : vector<12x12xf32> to vector<12x12xbf16>
    %cst_34 = arith.constant dense<0.000000e+00> : vector<12x4xf32>
    %106 = tpu.matmul %105, %94, %cst_34 {dimension_numbers = #tpu.dot_dimension_numbers<[1], [0], [0], [1], [0, 0, 1, 1], [], []>} : vector<12x12xbf16>, vector<12x4xbf16>, vector<12x4xf32> -> vector<12x4xf32>
    %107 = vector.extract_strided_slice %42 {offsets = [0, 16], sizes = [12, 4], strides = [1, 1]} : vector<24x32xbf16> to vector<12x4xbf16>
    %108 = vector.extract_strided_slice %44 {offsets = [0, 16], sizes = [12, 4], strides = [1, 1]} : vector<24x32xbf16> to vector<12x4xbf16>
    %109 = vector.extract_strided_slice %46 {offsets = [0, 16], sizes = [12, 4], strides = [1, 1]} : vector<24x32xbf16> to vector<12x4xbf16>
    %cst_35 = arith.constant dense<0.000000e+00> : vector<12x12xf32>
    %110 = tpu.matmul %107, %108, %cst_35 {dimension_numbers = #tpu.dot_dimension_numbers<[1], [1], [0], [0], [0, 0, 1, 0], [], []>} : vector<12x4xbf16>, vector<12x4xbf16>, vector<12x12xf32> -> vector<12x12xf32>
    %cst_36 = arith.constant dense<0xFF800000> : vector<12xf32>
    %111 = vector.multi_reduction <maximumf>, %110, %cst_36 [1] : vector<12x12xf32> to vector<12xf32>
    %112 = vector.shape_cast %111 : vector<12xf32> to vector<12x1xf32>
    %113 = vector.broadcast %112 : vector<12x1xf32> to vector<12x12xf32>
    %114 = arith.subf %110, %113 : vector<12x12xf32>
    %115 = math.exp %114 : vector<12x12xf32>
    %cst_37 = arith.constant dense<0.000000e+00> : vector<12xf32>
    %116 = vector.multi_reduction <add>, %115, %cst_37 [1] : vector<12x12xf32> to vector<12xf32>
    %117 = vector.shape_cast %116 : vector<12xf32> to vector<12x1xf32>
    %118 = vector.broadcast %117 : vector<12x1xf32> to vector<12x12xf32>
    %119 = arith.divf %115, %118 : vector<12x12xf32>
    %120 = arith.truncf %119 : vector<12x12xf32> to vector<12x12xbf16>
    %cst_38 = arith.constant dense<0.000000e+00> : vector<12x4xf32>
    %121 = tpu.matmul %120, %109, %cst_38 {dimension_numbers = #tpu.dot_dimension_numbers<[1], [0], [0], [1], [0, 0, 1, 1], [], []>} : vector<12x12xbf16>, vector<12x4xbf16>, vector<12x4xf32> -> vector<12x4xf32>
    %122 = vector.extract_strided_slice %42 {offsets = [0, 20], sizes = [12, 4], strides = [1, 1]} : vector<24x32xbf16> to vector<12x4xbf16>
    %123 = vector.extract_strided_slice %44 {offsets = [0, 20], sizes = [12, 4], strides = [1, 1]} : vector<24x32xbf16> to vector<12x4xbf16>
    %124 = vector.extract_strided_slice %46 {offsets = [0, 20], sizes = [12, 4], strides = [1, 1]} : vector<24x32xbf16> to vector<12x4xbf16>
    %cst_39 = arith.constant dense<0.000000e+00> : vector<12x12xf32>
    %125 = tpu.matmul %122, %123, %cst_39 {dimension_numbers = #tpu.dot_dimension_numbers<[1], [1], [0], [0], [0, 0, 1, 0], [], []>} : vector<12x4xbf16>, vector<12x4xbf16>, vector<12x12xf32> -> vector<12x12xf32>
    %cst_40 = arith.constant dense<0xFF800000> : vector<12xf32>
    %126 = vector.multi_reduction <maximumf>, %125, %cst_40 [1] : vector<12x12xf32> to vector<12xf32>
    %127 = vector.shape_cast %126 : vector<12xf32> to vector<12x1xf32>
    %128 = vector.broadcast %127 : vector<12x1xf32> to vector<12x12xf32>
    %129 = arith.subf %125, %128 : vector<12x12xf32>
    %130 = math.exp %129 : vector<12x12xf32>
    %cst_41 = arith.constant dense<0.000000e+00> : vector<12xf32>
    %131 = vector.multi_reduction <add>, %130, %cst_41 [1] : vector<12x12xf32> to vector<12xf32>
    %132 = vector.shape_cast %131 : vector<12xf32> to vector<12x1xf32>
    %133 = vector.broadcast %132 : vector<12x1xf32> to vector<12x12xf32>
    %134 = arith.divf %130, %133 : vector<12x12xf32>
    %135 = arith.truncf %134 : vector<12x12xf32> to vector<12x12xbf16>
    %cst_42 = arith.constant dense<0.000000e+00> : vector<12x4xf32>
    %136 = tpu.matmul %135, %124, %cst_42 {dimension_numbers = #tpu.dot_dimension_numbers<[1], [0], [0], [1], [0, 0, 1, 1], [], []>} : vector<12x12xbf16>, vector<12x4xbf16>, vector<12x4xf32> -> vector<12x4xf32>
    %137 = vector.extract_strided_slice %42 {offsets = [0, 24], sizes = [12, 4], strides = [1, 1]} : vector<24x32xbf16> to vector<12x4xbf16>
    %138 = vector.extract_strided_slice %44 {offsets = [0, 24], sizes = [12, 4], strides = [1, 1]} : vector<24x32xbf16> to vector<12x4xbf16>
    %139 = vector.extract_strided_slice %46 {offsets = [0, 24], sizes = [12, 4], strides = [1, 1]} : vector<24x32xbf16> to vector<12x4xbf16>
    %cst_43 = arith.constant dense<0.000000e+00> : vector<12x12xf32>
    %140 = tpu.matmul %137, %138, %cst_43 {dimension_numbers = #tpu.dot_dimension_numbers<[1], [1], [0], [0], [0, 0, 1, 0], [], []>} : vector<12x4xbf16>, vector<12x4xbf16>, vector<12x12xf32> -> vector<12x12xf32>
    %cst_44 = arith.constant dense<0xFF800000> : vector<12xf32>
    %141 = vector.multi_reduction <maximumf>, %140, %cst_44 [1] : vector<12x12xf32> to vector<12xf32>
    %142 = vector.shape_cast %141 : vector<12xf32> to vector<12x1xf32>
    %143 = vector.broadcast %142 : vector<12x1xf32> to vector<12x12xf32>
    %144 = arith.subf %140, %143 : vector<12x12xf32>
    %145 = math.exp %144 : vector<12x12xf32>
    %cst_45 = arith.constant dense<0.000000e+00> : vector<12xf32>
    %146 = vector.multi_reduction <add>, %145, %cst_45 [1] : vector<12x12xf32> to vector<12xf32>
    %147 = vector.shape_cast %146 : vector<12xf32> to vector<12x1xf32>
    %148 = vector.broadcast %147 : vector<12x1xf32> to vector<12x12xf32>
    %149 = arith.divf %145, %148 : vector<12x12xf32>
    %150 = arith.truncf %149 : vector<12x12xf32> to vector<12x12xbf16>
    %cst_46 = arith.constant dense<0.000000e+00> : vector<12x4xf32>
    %151 = tpu.matmul %150, %139, %cst_46 {dimension_numbers = #tpu.dot_dimension_numbers<[1], [0], [0], [1], [0, 0, 1, 1], [], []>} : vector<12x12xbf16>, vector<12x4xbf16>, vector<12x4xf32> -> vector<12x4xf32>
    %152 = vector.extract_strided_slice %42 {offsets = [0, 28], sizes = [12, 4], strides = [1, 1]} : vector<24x32xbf16> to vector<12x4xbf16>
    %153 = vector.extract_strided_slice %44 {offsets = [0, 28], sizes = [12, 4], strides = [1, 1]} : vector<24x32xbf16> to vector<12x4xbf16>
    %154 = vector.extract_strided_slice %46 {offsets = [0, 28], sizes = [12, 4], strides = [1, 1]} : vector<24x32xbf16> to vector<12x4xbf16>
    %cst_47 = arith.constant dense<0.000000e+00> : vector<12x12xf32>
    %155 = tpu.matmul %152, %153, %cst_47 {dimension_numbers = #tpu.dot_dimension_numbers<[1], [1], [0], [0], [0, 0, 1, 0], [], []>} : vector<12x4xbf16>, vector<12x4xbf16>, vector<12x12xf32> -> vector<12x12xf32>
    %cst_48 = arith.constant dense<0xFF800000> : vector<12xf32>
    %156 = vector.multi_reduction <maximumf>, %155, %cst_48 [1] : vector<12x12xf32> to vector<12xf32>
    %157 = vector.shape_cast %156 : vector<12xf32> to vector<12x1xf32>
    %158 = vector.broadcast %157 : vector<12x1xf32> to vector<12x12xf32>
    %159 = arith.subf %155, %158 : vector<12x12xf32>
    %160 = math.exp %159 : vector<12x12xf32>
    %cst_49 = arith.constant dense<0.000000e+00> : vector<12xf32>
    %161 = vector.multi_reduction <add>, %160, %cst_49 [1] : vector<12x12xf32> to vector<12xf32>
    %162 = vector.shape_cast %161 : vector<12xf32> to vector<12x1xf32>
    %163 = vector.broadcast %162 : vector<12x1xf32> to vector<12x12xf32>
    %164 = arith.divf %160, %163 : vector<12x12xf32>
    %165 = arith.truncf %164 : vector<12x12xf32> to vector<12x12xbf16>
    %cst_50 = arith.constant dense<0.000000e+00> : vector<12x4xf32>
    %166 = tpu.matmul %165, %154, %cst_50 {dimension_numbers = #tpu.dot_dimension_numbers<[1], [0], [0], [1], [0, 0, 1, 1], [], []>} : vector<12x12xbf16>, vector<12x4xbf16>, vector<12x4xf32> -> vector<12x4xf32>
    %167 = tpu.concatenate %61, %76, %91, %106, %121, %136, %151, %166 in 1 : vector<12x4xf32>, vector<12x4xf32>, vector<12x4xf32>, vector<12x4xf32>, vector<12x4xf32>, vector<12x4xf32>, vector<12x4xf32>, vector<12x4xf32> -> vector<12x32xf32>
    %168 = vector.extract_strided_slice %42 {offsets = [12, 0], sizes = [12, 4], strides = [1, 1]} : vector<24x32xbf16> to vector<12x4xbf16>
    %169 = vector.extract_strided_slice %44 {offsets = [12, 0], sizes = [12, 4], strides = [1, 1]} : vector<24x32xbf16> to vector<12x4xbf16>
    %170 = vector.extract_strided_slice %46 {offsets = [12, 0], sizes = [12, 4], strides = [1, 1]} : vector<24x32xbf16> to vector<12x4xbf16>
    %cst_51 = arith.constant dense<0.000000e+00> : vector<12x12xf32>
    %171 = tpu.matmul %168, %169, %cst_51 {dimension_numbers = #tpu.dot_dimension_numbers<[1], [1], [0], [0], [0, 0, 1, 0], [], []>} : vector<12x4xbf16>, vector<12x4xbf16>, vector<12x12xf32> -> vector<12x12xf32>
    %cst_52 = arith.constant dense<0xFF800000> : vector<12xf32>
    %172 = vector.multi_reduction <maximumf>, %171, %cst_52 [1] : vector<12x12xf32> to vector<12xf32>
    %173 = vector.shape_cast %172 : vector<12xf32> to vector<12x1xf32>
    %174 = vector.broadcast %173 : vector<12x1xf32> to vector<12x12xf32>
    %175 = arith.subf %171, %174 : vector<12x12xf32>
    %176 = math.exp %175 : vector<12x12xf32>
    %cst_53 = arith.constant dense<0.000000e+00> : vector<12xf32>
    %177 = vector.multi_reduction <add>, %176, %cst_53 [1] : vector<12x12xf32> to vector<12xf32>
    %178 = vector.shape_cast %177 : vector<12xf32> to vector<12x1xf32>
    %179 = vector.broadcast %178 : vector<12x1xf32> to vector<12x12xf32>
    %180 = arith.divf %176, %179 : vector<12x12xf32>
    %181 = arith.truncf %180 : vector<12x12xf32> to vector<12x12xbf16>
    %cst_54 = arith.constant dense<0.000000e+00> : vector<12x4xf32>
    %182 = tpu.matmul %181, %170, %cst_54 {dimension_numbers = #tpu.dot_dimension_numbers<[1], [0], [0], [1], [0, 0, 1, 1], [], []>} : vector<12x12xbf16>, vector<12x4xbf16>, vector<12x4xf32> -> vector<12x4xf32>
    %183 = vector.extract_strided_slice %42 {offsets = [12, 4], sizes = [12, 4], strides = [1, 1]} : vector<24x32xbf16> to vector<12x4xbf16>
    %184 = vector.extract_strided_slice %44 {offsets = [12, 4], sizes = [12, 4], strides = [1, 1]} : vector<24x32xbf16> to vector<12x4xbf16>
    %185 = vector.extract_strided_slice %46 {offsets = [12, 4], sizes = [12, 4], strides = [1, 1]} : vector<24x32xbf16> to vector<12x4xbf16>
    %cst_55 = arith.constant dense<0.000000e+00> : vector<12x12xf32>
    %186 = tpu.matmul %183, %184, %cst_55 {dimension_numbers = #tpu.dot_dimension_numbers<[1], [1], [0], [0], [0, 0, 1, 0], [], []>} : vector<12x4xbf16>, vector<12x4xbf16>, vector<12x12xf32> -> vector<12x12xf32>
    %cst_56 = arith.constant dense<0xFF800000> : vector<12xf32>
    %187 = vector.multi_reduction <maximumf>, %186, %cst_56 [1] : vector<12x12xf32> to vector<12xf32>
    %188 = vector.shape_cast %187 : vector<12xf32> to vector<12x1xf32>
    %189 = vector.broadcast %188 : vector<12x1xf32> to vector<12x12xf32>
    %190 = arith.subf %186, %189 : vector<12x12xf32>
    %191 = math.exp %190 : vector<12x12xf32>
    %cst_57 = arith.constant dense<0.000000e+00> : vector<12xf32>
    %192 = vector.multi_reduction <add>, %191, %cst_57 [1] : vector<12x12xf32> to vector<12xf32>
    %193 = vector.shape_cast %192 : vector<12xf32> to vector<12x1xf32>
    %194 = vector.broadcast %193 : vector<12x1xf32> to vector<12x12xf32>
    %195 = arith.divf %191, %194 : vector<12x12xf32>
    %196 = arith.truncf %195 : vector<12x12xf32> to vector<12x12xbf16>
    %cst_58 = arith.constant dense<0.000000e+00> : vector<12x4xf32>
    %197 = tpu.matmul %196, %185, %cst_58 {dimension_numbers = #tpu.dot_dimension_numbers<[1], [0], [0], [1], [0, 0, 1, 1], [], []>} : vector<12x12xbf16>, vector<12x4xbf16>, vector<12x4xf32> -> vector<12x4xf32>
    %198 = vector.extract_strided_slice %42 {offsets = [12, 8], sizes = [12, 4], strides = [1, 1]} : vector<24x32xbf16> to vector<12x4xbf16>
    %199 = vector.extract_strided_slice %44 {offsets = [12, 8], sizes = [12, 4], strides = [1, 1]} : vector<24x32xbf16> to vector<12x4xbf16>
    %200 = vector.extract_strided_slice %46 {offsets = [12, 8], sizes = [12, 4], strides = [1, 1]} : vector<24x32xbf16> to vector<12x4xbf16>
    %cst_59 = arith.constant dense<0.000000e+00> : vector<12x12xf32>
    %201 = tpu.matmul %198, %199, %cst_59 {dimension_numbers = #tpu.dot_dimension_numbers<[1], [1], [0], [0], [0, 0, 1, 0], [], []>} : vector<12x4xbf16>, vector<12x4xbf16>, vector<12x12xf32> -> vector<12x12xf32>
    %cst_60 = arith.constant dense<0xFF800000> : vector<12xf32>
    %202 = vector.multi_reduction <maximumf>, %201, %cst_60 [1] : vector<12x12xf32> to vector<12xf32>
    %203 = vector.shape_cast %202 : vector<12xf32> to vector<12x1xf32>
    %204 = vector.broadcast %203 : vector<12x1xf32> to vector<12x12xf32>
    %205 = arith.subf %201, %204 : vector<12x12xf32>
    %206 = math.exp %205 : vector<12x12xf32>
    %cst_61 = arith.constant dense<0.000000e+00> : vector<12xf32>
    %207 = vector.multi_reduction <add>, %206, %cst_61 [1] : vector<12x12xf32> to vector<12xf32>
    %208 = vector.shape_cast %207 : vector<12xf32> to vector<12x1xf32>
    %209 = vector.broadcast %208 : vector<12x1xf32> to vector<12x12xf32>
    %210 = arith.divf %206, %209 : vector<12x12xf32>
    %211 = arith.truncf %210 : vector<12x12xf32> to vector<12x12xbf16>
    %cst_62 = arith.constant dense<0.000000e+00> : vector<12x4xf32>
    %212 = tpu.matmul %211, %200, %cst_62 {dimension_numbers = #tpu.dot_dimension_numbers<[1], [0], [0], [1], [0, 0, 1, 1], [], []>} : vector<12x12xbf16>, vector<12x4xbf16>, vector<12x4xf32> -> vector<12x4xf32>
    %213 = vector.extract_strided_slice %42 {offsets = [12, 12], sizes = [12, 4], strides = [1, 1]} : vector<24x32xbf16> to vector<12x4xbf16>
    %214 = vector.extract_strided_slice %44 {offsets = [12, 12], sizes = [12, 4], strides = [1, 1]} : vector<24x32xbf16> to vector<12x4xbf16>
    %215 = vector.extract_strided_slice %46 {offsets = [12, 12], sizes = [12, 4], strides = [1, 1]} : vector<24x32xbf16> to vector<12x4xbf16>
    %cst_63 = arith.constant dense<0.000000e+00> : vector<12x12xf32>
    %216 = tpu.matmul %213, %214, %cst_63 {dimension_numbers = #tpu.dot_dimension_numbers<[1], [1], [0], [0], [0, 0, 1, 0], [], []>} : vector<12x4xbf16>, vector<12x4xbf16>, vector<12x12xf32> -> vector<12x12xf32>
    %cst_64 = arith.constant dense<0xFF800000> : vector<12xf32>
    %217 = vector.multi_reduction <maximumf>, %216, %cst_64 [1] : vector<12x12xf32> to vector<12xf32>
    %218 = vector.shape_cast %217 : vector<12xf32> to vector<12x1xf32>
    %219 = vector.broadcast %218 : vector<12x1xf32> to vector<12x12xf32>
    %220 = arith.subf %216, %219 : vector<12x12xf32>
    %221 = math.exp %220 : vector<12x12xf32>
    %cst_65 = arith.constant dense<0.000000e+00> : vector<12xf32>
    %222 = vector.multi_reduction <add>, %221, %cst_65 [1] : vector<12x12xf32> to vector<12xf32>
    %223 = vector.shape_cast %222 : vector<12xf32> to vector<12x1xf32>
    %224 = vector.broadcast %223 : vector<12x1xf32> to vector<12x12xf32>
    %225 = arith.divf %221, %224 : vector<12x12xf32>
    %226 = arith.truncf %225 : vector<12x12xf32> to vector<12x12xbf16>
    %cst_66 = arith.constant dense<0.000000e+00> : vector<12x4xf32>
    %227 = tpu.matmul %226, %215, %cst_66 {dimension_numbers = #tpu.dot_dimension_numbers<[1], [0], [0], [1], [0, 0, 1, 1], [], []>} : vector<12x12xbf16>, vector<12x4xbf16>, vector<12x4xf32> -> vector<12x4xf32>
    %228 = vector.extract_strided_slice %42 {offsets = [12, 16], sizes = [12, 4], strides = [1, 1]} : vector<24x32xbf16> to vector<12x4xbf16>
    %229 = vector.extract_strided_slice %44 {offsets = [12, 16], sizes = [12, 4], strides = [1, 1]} : vector<24x32xbf16> to vector<12x4xbf16>
    %230 = vector.extract_strided_slice %46 {offsets = [12, 16], sizes = [12, 4], strides = [1, 1]} : vector<24x32xbf16> to vector<12x4xbf16>
    %cst_67 = arith.constant dense<0.000000e+00> : vector<12x12xf32>
    %231 = tpu.matmul %228, %229, %cst_67 {dimension_numbers = #tpu.dot_dimension_numbers<[1], [1], [0], [0], [0, 0, 1, 0], [], []>} : vector<12x4xbf16>, vector<12x4xbf16>, vector<12x12xf32> -> vector<12x12xf32>
    %cst_68 = arith.constant dense<0xFF800000> : vector<12xf32>
    %232 = vector.multi_reduction <maximumf>, %231, %cst_68 [1] : vector<12x12xf32> to vector<12xf32>
    %233 = vector.shape_cast %232 : vector<12xf32> to vector<12x1xf32>
    %234 = vector.broadcast %233 : vector<12x1xf32> to vector<12x12xf32>
    %235 = arith.subf %231, %234 : vector<12x12xf32>
    %236 = math.exp %235 : vector<12x12xf32>
    %cst_69 = arith.constant dense<0.000000e+00> : vector<12xf32>
    %237 = vector.multi_reduction <add>, %236, %cst_69 [1] : vector<12x12xf32> to vector<12xf32>
    %238 = vector.shape_cast %237 : vector<12xf32> to vector<12x1xf32>
    %239 = vector.broadcast %238 : vector<12x1xf32> to vector<12x12xf32>
    %240 = arith.divf %236, %239 : vector<12x12xf32>
    %241 = arith.truncf %240 : vector<12x12xf32> to vector<12x12xbf16>
    %cst_70 = arith.constant dense<0.000000e+00> : vector<12x4xf32>
    %242 = tpu.matmul %241, %230, %cst_70 {dimension_numbers = #tpu.dot_dimension_numbers<[1], [0], [0], [1], [0, 0, 1, 1], [], []>} : vector<12x12xbf16>, vector<12x4xbf16>, vector<12x4xf32> -> vector<12x4xf32>
    %243 = vector.extract_strided_slice %42 {offsets = [12, 20], sizes = [12, 4], strides = [1, 1]} : vector<24x32xbf16> to vector<12x4xbf16>
    %244 = vector.extract_strided_slice %44 {offsets = [12, 20], sizes = [12, 4], strides = [1, 1]} : vector<24x32xbf16> to vector<12x4xbf16>
    %245 = vector.extract_strided_slice %46 {offsets = [12, 20], sizes = [12, 4], strides = [1, 1]} : vector<24x32xbf16> to vector<12x4xbf16>
    %cst_71 = arith.constant dense<0.000000e+00> : vector<12x12xf32>
    %246 = tpu.matmul %243, %244, %cst_71 {dimension_numbers = #tpu.dot_dimension_numbers<[1], [1], [0], [0], [0, 0, 1, 0], [], []>} : vector<12x4xbf16>, vector<12x4xbf16>, vector<12x12xf32> -> vector<12x12xf32>
    %cst_72 = arith.constant dense<0xFF800000> : vector<12xf32>
    %247 = vector.multi_reduction <maximumf>, %246, %cst_72 [1] : vector<12x12xf32> to vector<12xf32>
    %248 = vector.shape_cast %247 : vector<12xf32> to vector<12x1xf32>
    %249 = vector.broadcast %248 : vector<12x1xf32> to vector<12x12xf32>
    %250 = arith.subf %246, %249 : vector<12x12xf32>
    %251 = math.exp %250 : vector<12x12xf32>
    %cst_73 = arith.constant dense<0.000000e+00> : vector<12xf32>
    %252 = vector.multi_reduction <add>, %251, %cst_73 [1] : vector<12x12xf32> to vector<12xf32>
    %253 = vector.shape_cast %252 : vector<12xf32> to vector<12x1xf32>
    %254 = vector.broadcast %253 : vector<12x1xf32> to vector<12x12xf32>
    %255 = arith.divf %251, %254 : vector<12x12xf32>
    %256 = arith.truncf %255 : vector<12x12xf32> to vector<12x12xbf16>
    %cst_74 = arith.constant dense<0.000000e+00> : vector<12x4xf32>
    %257 = tpu.matmul %256, %245, %cst_74 {dimension_numbers = #tpu.dot_dimension_numbers<[1], [0], [0], [1], [0, 0, 1, 1], [], []>} : vector<12x12xbf16>, vector<12x4xbf16>, vector<12x4xf32> -> vector<12x4xf32>
    %258 = vector.extract_strided_slice %42 {offsets = [12, 24], sizes = [12, 4], strides = [1, 1]} : vector<24x32xbf16> to vector<12x4xbf16>
    %259 = vector.extract_strided_slice %44 {offsets = [12, 24], sizes = [12, 4], strides = [1, 1]} : vector<24x32xbf16> to vector<12x4xbf16>
    %260 = vector.extract_strided_slice %46 {offsets = [12, 24], sizes = [12, 4], strides = [1, 1]} : vector<24x32xbf16> to vector<12x4xbf16>
    %cst_75 = arith.constant dense<0.000000e+00> : vector<12x12xf32>
    %261 = tpu.matmul %258, %259, %cst_75 {dimension_numbers = #tpu.dot_dimension_numbers<[1], [1], [0], [0], [0, 0, 1, 0], [], []>} : vector<12x4xbf16>, vector<12x4xbf16>, vector<12x12xf32> -> vector<12x12xf32>
    %cst_76 = arith.constant dense<0xFF800000> : vector<12xf32>
    %262 = vector.multi_reduction <maximumf>, %261, %cst_76 [1] : vector<12x12xf32> to vector<12xf32>
    %263 = vector.shape_cast %262 : vector<12xf32> to vector<12x1xf32>
    %264 = vector.broadcast %263 : vector<12x1xf32> to vector<12x12xf32>
    %265 = arith.subf %261, %264 : vector<12x12xf32>
    %266 = math.exp %265 : vector<12x12xf32>
    %cst_77 = arith.constant dense<0.000000e+00> : vector<12xf32>
    %267 = vector.multi_reduction <add>, %266, %cst_77 [1] : vector<12x12xf32> to vector<12xf32>
    %268 = vector.shape_cast %267 : vector<12xf32> to vector<12x1xf32>
    %269 = vector.broadcast %268 : vector<12x1xf32> to vector<12x12xf32>
    %270 = arith.divf %266, %269 : vector<12x12xf32>
    %271 = arith.truncf %270 : vector<12x12xf32> to vector<12x12xbf16>
    %cst_78 = arith.constant dense<0.000000e+00> : vector<12x4xf32>
    %272 = tpu.matmul %271, %260, %cst_78 {dimension_numbers = #tpu.dot_dimension_numbers<[1], [0], [0], [1], [0, 0, 1, 1], [], []>} : vector<12x12xbf16>, vector<12x4xbf16>, vector<12x4xf32> -> vector<12x4xf32>
    %273 = vector.extract_strided_slice %42 {offsets = [12, 28], sizes = [12, 4], strides = [1, 1]} : vector<24x32xbf16> to vector<12x4xbf16>
    %274 = vector.extract_strided_slice %44 {offsets = [12, 28], sizes = [12, 4], strides = [1, 1]} : vector<24x32xbf16> to vector<12x4xbf16>
    %275 = vector.extract_strided_slice %46 {offsets = [12, 28], sizes = [12, 4], strides = [1, 1]} : vector<24x32xbf16> to vector<12x4xbf16>
    %cst_79 = arith.constant dense<0.000000e+00> : vector<12x12xf32>
    %276 = tpu.matmul %273, %274, %cst_79 {dimension_numbers = #tpu.dot_dimension_numbers<[1], [1], [0], [0], [0, 0, 1, 0], [], []>} : vector<12x4xbf16>, vector<12x4xbf16>, vector<12x12xf32> -> vector<12x12xf32>
    %cst_80 = arith.constant dense<0xFF800000> : vector<12xf32>
    %277 = vector.multi_reduction <maximumf>, %276, %cst_80 [1] : vector<12x12xf32> to vector<12xf32>
    %278 = vector.shape_cast %277 : vector<12xf32> to vector<12x1xf32>
    %279 = vector.broadcast %278 : vector<12x1xf32> to vector<12x12xf32>
    %280 = arith.subf %276, %279 : vector<12x12xf32>
    %281 = math.exp %280 : vector<12x12xf32>
    %cst_81 = arith.constant dense<0.000000e+00> : vector<12xf32>
    %282 = vector.multi_reduction <add>, %281, %cst_81 [1] : vector<12x12xf32> to vector<12xf32>
    %283 = vector.shape_cast %282 : vector<12xf32> to vector<12x1xf32>
    %284 = vector.broadcast %283 : vector<12x1xf32> to vector<12x12xf32>
    %285 = arith.divf %281, %284 : vector<12x12xf32>
    %286 = arith.truncf %285 : vector<12x12xf32> to vector<12x12xbf16>
    %cst_82 = arith.constant dense<0.000000e+00> : vector<12x4xf32>
    %287 = tpu.matmul %286, %275, %cst_82 {dimension_numbers = #tpu.dot_dimension_numbers<[1], [0], [0], [1], [0, 0, 1, 1], [], []>} : vector<12x12xbf16>, vector<12x4xbf16>, vector<12x4xf32> -> vector<12x4xf32>
    %288 = tpu.concatenate %182, %197, %212, %227, %242, %257, %272, %287 in 1 : vector<12x4xf32>, vector<12x4xf32>, vector<12x4xf32>, vector<12x4xf32>, vector<12x4xf32>, vector<12x4xf32>, vector<12x4xf32>, vector<12x4xf32> -> vector<12x32xf32>
    %289 = tpu.concatenate %167, %288 in 0 : vector<12x32xf32>, vector<12x32xf32> -> vector<24x32xf32>
    %290 = arith.truncf %289 : vector<24x32xf32> to vector<24x32xbf16>
    %c0_83 = arith.constant 0 : index
    %c0_84 = arith.constant 0 : index
    %c0_85 = arith.constant 0 : index
    %291 = vector.load %arg4[%c0_83, %c0_84, %c0_85] : memref<1x32x32xbf16, #tpu.memory_space<vmem>>, vector<1x32x32xbf16>
    %292 = vector.shape_cast %291 : vector<1x32x32xbf16> to vector<32x32xbf16>
    %cst_86 = arith.constant dense<0.000000e+00> : vector<24x32xf32>
    %293 = tpu.matmul %290, %292, %cst_86 {dimension_numbers = #tpu.dot_dimension_numbers<[1], [0], [0], [1], [0, 0, 1, 1], [], []>} : vector<24x32xbf16>, vector<32x32xbf16>, vector<24x32xf32> -> vector<24x32xf32>
    %c0_87 = arith.constant 0 : index
    %c0_88 = arith.constant 0 : index
    %c0_89 = arith.constant 0 : index
    %294 = vector.load %arg5[%c0_87, %c0_88, %c0_89] : memref<1x1x32xf32, #tpu.memory_space<vmem>>, vector<1x1x32xf32>
    %295 = vector.shape_cast %294 : vector<1x1x32xf32> to vector<1x32xf32>
    %296 = vector.broadcast %295 : vector<1x32xf32> to vector<24x32xf32>
    %297 = arith.addf %293, %296 : vector<24x32xf32>
    %298 = arith.addf %12, %297 : vector<24x32xf32>
    %cst_90 = arith.constant dense<0.000000e+00> : vector<24xf32>
    %299 = vector.multi_reduction <add>, %298, %cst_90 [1] : vector<24x32xf32> to vector<24xf32>
    %300 = vector.shape_cast %299 : vector<24xf32> to vector<24x1xf32>
    %cst_91 = arith.constant 3.200000e+01 : f32
    %301 = vector.broadcast %cst_91 : f32 to vector<24x1xf32>
    %302 = arith.divf %300, %301 : vector<24x1xf32>
    %303 = vector.broadcast %302 : vector<24x1xf32> to vector<24x32xf32>
    %304 = arith.subf %298, %303 : vector<24x32xf32>
    %305 = arith.mulf %304, %304 : vector<24x32xf32>
    %cst_92 = arith.constant dense<0.000000e+00> : vector<24xf32>
    %306 = vector.multi_reduction <add>, %305, %cst_92 [1] : vector<24x32xf32> to vector<24xf32>
    %307 = vector.shape_cast %306 : vector<24xf32> to vector<24x1xf32>
    %cst_93 = arith.constant 3.200000e+01 : f32
    %308 = vector.broadcast %cst_93 : f32 to vector<24x1xf32>
    %309 = arith.divf %307, %308 : vector<24x1xf32>
    %cst_94 = arith.constant 9.99999974E-6 : f32
    %310 = vector.broadcast %cst_94 : f32 to vector<24x1xf32>
    %311 = arith.addf %309, %310 : vector<24x1xf32>
    %312 = math.rsqrt %311 : vector<24x1xf32>
    %313 = vector.broadcast %312 : vector<24x1xf32> to vector<24x32xf32>
    %314 = arith.mulf %304, %313 : vector<24x32xf32>
    %c0_95 = arith.constant 0 : index
    %c0_96 = arith.constant 0 : index
    %c0_97 = arith.constant 0 : index
    %315 = vector.load %arg8[%c0_95, %c0_96, %c0_97] : memref<1x1x32xf32, #tpu.memory_space<vmem>>, vector<1x1x32xf32>
    %316 = vector.shape_cast %315 : vector<1x1x32xf32> to vector<1x32xf32>
    %317 = vector.broadcast %316 : vector<1x32xf32> to vector<24x32xf32>
    %318 = arith.mulf %314, %317 : vector<24x32xf32>
    %c0_98 = arith.constant 0 : index
    %c0_99 = arith.constant 0 : index
    %c0_100 = arith.constant 0 : index
    %319 = vector.load %arg9[%c0_98, %c0_99, %c0_100] : memref<1x1x32xf32, #tpu.memory_space<vmem>>, vector<1x1x32xf32>
    %320 = vector.shape_cast %319 : vector<1x1x32xf32> to vector<1x32xf32>
    %321 = vector.broadcast %320 : vector<1x32xf32> to vector<24x32xf32>
    %322 = arith.addf %318, %321 : vector<24x32xf32>
    %323 = arith.truncf %322 : vector<24x32xf32> to vector<24x32xbf16>
    %c0_101 = arith.constant 0 : index
    %c0_102 = arith.constant 0 : index
    %c0_103 = arith.constant 0 : index
    %324 = vector.load %arg10[%c0_101, %c0_102, %c0_103] : memref<1x32x64xbf16, #tpu.memory_space<vmem>>, vector<1x32x64xbf16>
    %325 = vector.shape_cast %324 : vector<1x32x64xbf16> to vector<32x64xbf16>
    %cst_104 = arith.constant dense<0.000000e+00> : vector<24x64xf32>
    %326 = tpu.matmul %323, %325, %cst_104 {dimension_numbers = #tpu.dot_dimension_numbers<[1], [0], [0], [1], [0, 0, 1, 1], [], []>} : vector<24x32xbf16>, vector<32x64xbf16>, vector<24x64xf32> -> vector<24x64xf32>
    %c0_105 = arith.constant 0 : index
    %c0_106 = arith.constant 0 : index
    %c0_107 = arith.constant 0 : index
    %327 = vector.load %arg11[%c0_105, %c0_106, %c0_107] : memref<1x1x64xf32, #tpu.memory_space<vmem>>, vector<1x1x64xf32>
    %328 = vector.shape_cast %327 : vector<1x1x64xf32> to vector<1x64xf32>
    %329 = vector.broadcast %328 : vector<1x64xf32> to vector<24x64xf32>
    %330 = arith.addf %326, %329 : vector<24x64xf32>
    %cst_108 = arith.constant 0.000000e+00 : f32
    %331 = vector.broadcast %cst_108 : f32 to vector<24x64xf32>
    %332 = arith.maximumf %330, %331 : vector<24x64xf32>
    %333 = arith.truncf %332 : vector<24x64xf32> to vector<24x64xbf16>
    %c0_109 = arith.constant 0 : index
    %c0_110 = arith.constant 0 : index
    %c0_111 = arith.constant 0 : index
    %334 = vector.load %arg12[%c0_109, %c0_110, %c0_111] : memref<1x64x32xbf16, #tpu.memory_space<vmem>>, vector<1x64x32xbf16>
    %335 = vector.shape_cast %334 : vector<1x64x32xbf16> to vector<64x32xbf16>
    %cst_112 = arith.constant dense<0.000000e+00> : vector<24x32xf32>
    %336 = tpu.matmul %333, %335, %cst_112 {dimension_numbers = #tpu.dot_dimension_numbers<[1], [0], [0], [1], [0, 0, 1, 1], [], []>} : vector<24x64xbf16>, vector<64x32xbf16>, vector<24x32xf32> -> vector<24x32xf32>
    %c0_113 = arith.constant 0 : index
    %c0_114 = arith.constant 0 : index
    %c0_115 = arith.constant 0 : index
    %337 = vector.load %arg13[%c0_113, %c0_114, %c0_115] : memref<1x1x32xf32, #tpu.memory_space<vmem>>, vector<1x1x32xf32>
    %338 = vector.shape_cast %337 : vector<1x1x32xf32> to vector<1x32xf32>
    %339 = vector.broadcast %338 : vector<1x32xf32> to vector<24x32xf32>
    %340 = arith.addf %336, %339 : vector<24x32xf32>
    %341 = arith.addf %298, %340 : vector<24x32xf32>
    %c1_i32_116 = arith.constant 1 : i32
    %342 = arith.cmpi eq, %arg0, %c1_i32_116 : i32
    %343 = vector.extract_strided_slice %341 {offsets = [0, 0], sizes = [12, 32], strides = [1, 1]} : vector<24x32xf32> to vector<12x32xf32>
    %c0_i32_117 = arith.constant 0 : i32
    %344 = arith.addi %0, %c0_i32_117 : i32
    %345 = arith.index_cast %344 : i32 to index
    %c0_118 = arith.constant 0 : index
    %c0_119 = arith.constant 0 : index
    %346 = vector.load %arg15[%345, %c0_118, %c0_119] : memref<2x12x32xf32, #tpu.memory_space<vmem>>, vector<1x12x32xf32>
    %347 = vector.shape_cast %346 : vector<1x12x32xf32> to vector<12x32xf32>
    %348 = vector.shape_cast %343 : vector<12x32xf32> to vector<1x12x32xf32>
    tpu.vector_store %arg15[%345, %c0_118, %c0_119], %348 {strides = array<i32>} : memref<2x12x32xf32, #tpu.memory_space<vmem>>, vector<1x12x32xf32>,
    %349 = arith.extui %342 : i1 to i32
    %c0_i32_120 = arith.constant 0 : i32
    %350 = arith.cmpi ne, %349, %c0_i32_120 : i32
    scf.if %350 {
      %359 = vector.extract_strided_slice %343 {offsets = [4, 0], sizes = [8, 32], strides = [1, 1]} : vector<12x32xf32> to vector<8x32xf32>
      %c0_125 = arith.constant 0 : index
      %c0_126 = arith.constant 0 : index
      %c0_127 = arith.constant 0 : index
      %360 = vector.load %arg14[%c0_125, %c0_126, %c0_127] : memref<2x8x32xf32, #tpu.memory_space<vmem>>, vector<1x8x32xf32>
      %361 = vector.shape_cast %360 : vector<1x8x32xf32> to vector<8x32xf32>
      %362 = vector.shape_cast %359 : vector<8x32xf32> to vector<1x8x32xf32>
      tpu.vector_store %arg14[%c0_125, %c0_126, %c0_127], %362 {strides = array<i32>} : memref<2x8x32xf32, #tpu.memory_space<vmem>>, vector<1x8x32xf32>,
    } else {
    }
    %351 = vector.extract_strided_slice %341 {offsets = [12, 0], sizes = [12, 32], strides = [1, 1]} : vector<24x32xf32> to vector<12x32xf32>
    %c1_i32_121 = arith.constant 1 : i32
    %352 = arith.addi %0, %c1_i32_121 : i32
    %353 = arith.index_cast %352 : i32 to index
    %c0_122 = arith.constant 0 : index
    %c0_123 = arith.constant 0 : index
    %354 = vector.load %arg15[%353, %c0_122, %c0_123] : memref<2x12x32xf32, #tpu.memory_space<vmem>>, vector<1x12x32xf32>
    %355 = vector.shape_cast %354 : vector<1x12x32xf32> to vector<12x32xf32>
    %356 = vector.shape_cast %351 : vector<12x32xf32> to vector<1x12x32xf32>
    tpu.vector_store %arg15[%353, %c0_122, %c0_123], %356 {strides = array<i32>} : memref<2x12x32xf32, #tpu.memory_space<vmem>>, vector<1x12x32xf32>,
    %357 = arith.extui %342 : i1 to i32
    %c0_i32_124 = arith.constant 0 : i32
    %358 = arith.cmpi ne, %357, %c0_i32_124 : i32
    scf.if %358 {
      %359 = vector.extract_strided_slice %351 {offsets = [4, 0], sizes = [8, 32], strides = [1, 1]} : vector<12x32xf32> to vector<8x32xf32>
      %c1 = arith.constant 1 : index
      %c0_125 = arith.constant 0 : index
      %c0_126 = arith.constant 0 : index
      %360 = vector.load %arg14[%c1, %c0_125, %c0_126] : memref<2x8x32xf32, #tpu.memory_space<vmem>>, vector<1x8x32xf32>
      %361 = vector.shape_cast %360 : vector<1x8x32xf32> to vector<8x32xf32>
      %362 = vector.shape_cast %359 : vector<8x32xf32> to vector<1x8x32xf32>
      tpu.vector_store %arg14[%c1, %c0_125, %c0_126], %362 {strides = array<i32>} : memref<2x8x32xf32, #tpu.memory_space<vmem>>, vector<1x8x32xf32>,
    } else {
    }
    return
  }
  func.func @transform_0(%arg0: i32, %arg1: i32) -> (i32, i32, i32) {
    %c0_i32 = arith.constant 0 : i32
    %c0_i32_0 = arith.constant 0 : i32
    %c0_i32_1 = arith.constant 0 : i32
    %c0_i32_2 = arith.constant 0 : i32
    return %c0_i32, %c0_i32_0, %c0_i32_1 : i32, i32, i32
  }
  func.func @transform_1(%arg0: i32, %arg1: i32) -> (i32, i32, i32) {
    %c0_i32 = arith.constant 0 : i32
    %c0_i32_0 = arith.constant 0 : i32
    %c0_i32_1 = arith.constant 0 : i32
    return %arg0, %c0_i32, %c0_i32_0 : i32, i32, i32
  }
  func.func @transform_2(%arg0: i32, %arg1: i32) -> (i32, i32, i32) {
    %c0_i32 = arith.constant 0 : i32
    %c0_i32_0 = arith.constant 0 : i32
    %c0_i32_1 = arith.constant 0 : i32
    return %arg0, %c0_i32, %c0_i32_0 : i32, i32, i32
  }
  func.func @transform_3(%arg0: i32, %arg1: i32) -> (i32, i32, i32) {
    %c0_i32 = arith.constant 0 : i32
    %c0_i32_0 = arith.constant 0 : i32
    %c0_i32_1 = arith.constant 0 : i32
    return %arg0, %c0_i32, %c0_i32_0 : i32, i32, i32
  }
  func.func @transform_4(%arg0: i32, %arg1: i32) -> (i32, i32, i32) {
    %c0_i32 = arith.constant 0 : i32
    %c0_i32_0 = arith.constant 0 : i32
    %c0_i32_1 = arith.constant 0 : i32
    return %arg0, %c0_i32, %c0_i32_0 : i32, i32, i32
  }
  func.func @transform_5(%arg0: i32, %arg1: i32) -> (i32, i32, i32) {
    %c0_i32 = arith.constant 0 : i32
    %c0_i32_0 = arith.constant 0 : i32
    %c0_i32_1 = arith.constant 0 : i32
    return %arg0, %c0_i32, %c0_i32_0 : i32, i32, i32
  }
  func.func @transform_6(%arg0: i32, %arg1: i32) -> (i32, i32, i32) {
    %c0_i32 = arith.constant 0 : i32
    %c0_i32_0 = arith.constant 0 : i32
    %c0_i32_1 = arith.constant 0 : i32
    return %arg0, %c0_i32, %c0_i32_0 : i32, i32, i32
  }
  func.func @transform_7(%arg0: i32, %arg1: i32) -> (i32, i32, i32) {
    %c0_i32 = arith.constant 0 : i32
    %c0_i32_0 = arith.constant 0 : i32
    %c0_i32_1 = arith.constant 0 : i32
    return %arg0, %c0_i32, %c0_i32_0 : i32, i32, i32
  }
  func.func @transform_8(%arg0: i32, %arg1: i32) -> (i32, i32, i32) {
    %c0_i32 = arith.constant 0 : i32
    %c0_i32_0 = arith.constant 0 : i32
    %c0_i32_1 = arith.constant 0 : i32
    return %arg0, %c0_i32, %c0_i32_0 : i32, i32, i32
  }
  func.func @transform_9(%arg0: i32, %arg1: i32) -> (i32, i32, i32) {
    %c0_i32 = arith.constant 0 : i32
    %c0_i32_0 = arith.constant 0 : i32
    %c0_i32_1 = arith.constant 0 : i32
    return %arg0, %c0_i32, %c0_i32_0 : i32, i32, i32
  }
  func.func @transform_10(%arg0: i32, %arg1: i32) -> (i32, i32, i32) {
    %c0_i32 = arith.constant 0 : i32
    %c0_i32_0 = arith.constant 0 : i32
    %c0_i32_1 = arith.constant 0 : i32
    return %arg0, %c0_i32, %c0_i32_0 : i32, i32, i32
  }
  func.func @transform_11(%arg0: i32, %arg1: i32) -> (i32, i32, i32) {
    %c0_i32 = arith.constant 0 : i32
    %c0_i32_0 = arith.constant 0 : i32
    %c0_i32_1 = arith.constant 0 : i32
    return %arg0, %c0_i32, %c0_i32_0 : i32, i32, i32
  }
  func.func @transform_12(%arg0: i32, %arg1: i32) -> (i32, i32, i32) {
    %c0_i32 = arith.constant 0 : i32
    %c0_i32_0 = arith.constant 0 : i32
    %c0_i32_1 = arith.constant 0 : i32
    return %arg1, %c0_i32, %c0_i32_0 : i32, i32, i32
  }
}

</mosaic_0001>

<bundles_post_ra>
// kernel: transformer_mapper_forward.1
= control target key start
LH: loop header
LB: loop body
LE: loop exit
PB: predicated region body
PF: predicated region fallthrough
CT: control target
= control target key end

     0   :  { %s5100_s0 = inlined_call_operand.vmem [shape: f32[2,12,32], index: 0, kind: input, shape index: {}]   ;;  %s5101_s1 = inlined_call_operand.vmem [shape: bf16[2,32,96], index: 1, kind: input, shape index: {}]   ;;  %s5102_s2 = inlined_call_operand.vmem [shape: bf16[2,32,32], index: 2, kind: input, shape index: {}]   ;;  %s5103_s3 = inlined_call_operand.vmem [shape: f32[2,1,32], index: 3, kind: input, shape index: {}]   ;;  %s5104_s4 = inlined_call_operand.vmem [shape: f32[2,1,32], index: 4, kind: input, shape index: {}]   ;;  %s5105_s5 = inlined_call_operand.vmem [shape: f32[2,1,32], index: 5, kind: input, shape index: {}]   ;;  %s5106_s6 = inlined_call_operand.vmem [shape: f32[2,1,32], index: 6, kind: input, shape index: {}]   ;;  %s5107_s7 = inlined_call_operand.vmem [shape: f32[2,1,32], index: 7, kind: input, shape index: {}]   ;;  %s5108_s8 = inlined_call_operand.vmem [shape: bf16[2,32,64], index: 8, kind: input, shape index: {}]   ;;  %s5109_s9 = inlined_call_operand.vmem [shape: f32[2,1,64], index: 9, kind: input, shape index: {}]   ;;  %s5110_s10 = inlined_call_operand.vmem [shape: bf16[2,64,32], index: 10, kind: input, shape index: {}]   ;;  %s5111_s11 = inlined_call_operand.vmem [shape: f32[2,1,32], index: 11, kind: input, shape index: {}]   ;;  %s5112_s12 = inlined_call_operand.hbm [shape: f32[2,8,32], index: 12, kind: output, shape index: {}]  }
   0x1   :  { %5116 = sst [smem:[#allocation9_spill]] %s5101_s1 }
   0x2   :  { %5117 = sst [smem:[#allocation10_spill]] %s5102_s2 }
   0x3   :  { %5118 = sst [smem:[#allocation11_spill]] %s5112_s12 }
   0x4   :  { %17 = vsyncpa [#allocation4], 0  ;;  %s4234_s21 = smov 0   ;;  %s4236_s22 = smov 0  }
   0x5   :  { %s4238_s23 = smov 0  }
   0x6 LB: > { %5119 = sst [smem:[#allocation6_spill]] %s4129_s22  ;;  %s35_s25 = sadd.s32 1, %s4129_s22  ;;  %s4133_s23 = sphi %s4238_s23, %s23_s23   ;;  %s4129_s22 = sphi %s4236_s22, %s5136_s22   ;;  %s4125_s21 = sphi %s4234_s21, %s5135_s21  }
   0x7   : > { %5120 = sst [smem:[#allocation7_spill]] %s4133_s23  ;;  %p37_p0 = scmp.ge.s32.totalorder %s35_s25, 2 }
   0x8   : > { %p3401_p1 = scmp.ge.s32.totalorder %s4133_s23, 1  ;;  %p461_p2 = scmp.lt.s32.totalorder %s4133_s23, 3 }
   0x9   : > { %s5138_s25 = smov (%p37_p0, %s35_s25), 0 }
   0xa   : > { %5121 = sst [smem:[#allocation8_spill]] %s5138_s25  ;;  %p462_p3 = pnand %p3401_p1, %p461_p2 }
   0xb   : > { %p534_p4 = scmp.lt.s32.totalorder (!%p462_p3), %s4125_s21, 1  ;;  %s5122_s1 = sld [smem:[#allocation9_spill]] (!%p462_p3) }
   0xc   : > { %465 = sbr.rel (%p462_p3) target bundleno = 2753 (0xac1), region = 68  ;;  %s5123_s2 = sld [smem:[#allocation10_spill]] (!%p462_p3) }
   0xd   : > { %p3410_p5 = scmp.ne.s32.totalorder (!%p462_p3), %s4125_s21, 0 }
  0x13   : > { %s4257_s26 = scalar_select %p534_p4, %s4125_s21, 1 }
  0x14   : > { %581 = sbr.rel (%p3410_p5) target bundleno = 27 (0x1b), region = 72  ;;  %v584_v0 = vld [vmem:[%s5100_s0] sm:$0xff] (!%p3410_p5)  ;;  %vm587_vm0 = vcmask (!%p3410_p5), 261120   ;;  %v585_v1 = vld [vmem:[%s5100_s0 + $0x8] sm:$0xf] (!%p3410_p5)  ;;  %vm589_vm1 = vcmask (!%p3410_p5), 257024  }
  0x15   : > { %s3482_s27 = sshll.u32 %s4257_s26, 4  ;;  %s3485_s24 = sshll.u32 %s4257_s26, 5  ;;  %v3411_v2 = vld [vmem:[%s5100_s0 + $0x10] sm:$0xff] (!%p3410_p5)  ;;  %588 = vst.msk [vmem:[#allocation2] sm:$0xff] (!%p3410_p5), %vm587_vm0, %v584_v0  ;;  %v3412_v3 = vld [vmem:[%s5100_s0 + $0x18] sm:$0xf] (!%p3410_p5) }
  0x16   : > { %s4267_s15 = scalar_lea.vmem %s5122_s1, %s3482_s27  ;;  %s4272_s18 = scalar_lea.vmem %s5123_s2, %s3482_s27  ;;  %590 = vst.msk [vmem:[#allocation2 + $0x8] sm:$0xf] (!%p3410_p5), %vm589_vm1, %v585_v1  ;;  %3414 = vst.msk [vmem:[#allocation2 + $0x18] sm:$0xf] (!%p3410_p5), %vm589_vm1, %v3412_v3 }
  0x17   : > { %s558_s1 = scalar_lea.vmem %s5107_s7, %s4257_s26  ;;  %s4293_s17 = scalar_lea.vmem %s5108_s8, %s3482_s27  ;;  %3413 = vst.msk [vmem:[#allocation2 + $0x10] sm:$0xff] (!%p3410_p5), %vm587_vm0, %v3411_v2 }
  0x18   : > { %s4307_s30 = scalar_lea.vmem %s5110_s10, %s3485_s24 }
  0x1b PF: > { %vm617_vm2 = vcmask 261120   ;;  %vm610_vm3 = vcmask 1043456   ;;  %v3930_v30 = vld [vmem:[%s4267_s15] sm:$0xff]   ;;  %v3931_v31 = vld [vmem:[%s4267_s15 + $0x8] sm:$0xff]   ;;  %s5124_s25 = scalar_lea.vmem %s5104_s4, %s4257_s26  ;;  %s5125_s23 = scalar_lea.vmem %s5105_s5, %s4257_s26  ;;  %v4135_v57 = vmov 0.0   ;;  %vm4136_vm4 = vmmov 0  }
  0x1c   : > { %v601_v4 = vld [vmem:[#allocation2] sm:$0xff]  ;;  %3568 = vmatprep.subr.bf16.mxu0 %v3930_v30  ;;  %3576 = vmatprep.subr.bf16.mxu1 %v4135_v57  ;;  %s4137_s27 = smov 92   ;;  %s4138_s2 = smov 96   ;;  %vm1815_vm5 = vcmask 1041408   ;;  %vm755_vm6 = vcmask 31744   ;;  %vm833_vm7 = vcmask 1045504  }
  0x1d   : > { %v3416_v6 = vld [vmem:[#allocation2 + $0x18] sm:$0xf]  ;;  %v618_v7 = vsel %vm617_vm2, %v601_v4, 0.0  ;;  %v602_v10 = vld [vmem:[#allocation2 + $0x8] sm:$0xf]  ;;  %3569 = vmatpush3.bf16.msra.mxu0 %v3930_v30  ;;  %3578 = vmatprep.mubr.msk.bf16.mxu1 %vm4136_vm4, %v4135_v57  ;;  %s4139_s13 = smov 124  }
  0x1e   : > { %v3415_v5 = vld [vmem:[#allocation2 + $0x10] sm:$0xff]  ;;  %v612_v9 = vrot.slane %v3416_v6, 4  ;;  %619 = vadd.xlane.f32.xlu0 %v618_v7  ;;  %3570 = vmatprep.subr.bf16.mxu0 %v3931_v31  ;;  %v3417_v43 = vld [vmem:[%s5124_s25] ss:$0 sm:$0xff]  ;;  %s4140_s14 = smov 120   ;;  %s4141_s16 = smov 88  }
  0x1f   : > { %v611_v8 = vrot.slane %v3415_v5, 4  ;;  %v3418_v49 = vld [vmem:[%s5125_s23] ss:$0 sm:$0xff]  ;;  %s4142_s24 = smov 116   ;;  %s4143_s19 = smov 84   ;;  %vm803_vm8 = vcmask 97280  }
  0x20   : > { %s4144_s15 = smov 112   ;;  %s4145_s22 = smov 80   ;;  %vm807_vm9 = vcmask 93184   ;;  %vm1797_vm10 = vcmask 64512   ;;  %vm1802_vm11 = vcmask 130048   ;;  %vm1805_vm12 = vcmask 162816  }
  0x21   : > { %v4324_v11 = vsel %vm610_vm3, %v611_v8, %v612_v9  ;;  %v4327_v12 = vsel %vm610_vm3, %v602_v10, %v611_v8  ;;  %3571 = vmatpush3.bf16.msra.mxu0 %v3931_v31  ;;  %s4146_s25 = smov 108   ;;  %s4147_s28 = smov 76   ;;  %vm1808_vm13 = vcmask 195584   ;;  %vm1811_vm14 = vcmask 228352  }
  0x22   : > { %v624_v13 = vsel %vm617_vm2, %v4324_v11, 0.0  ;;  %v621_v14 = vsel %vm617_vm2, %v4327_v12, 0.0  ;;  %3582 = vmatprep.subr.bf16.mxu0 %v4135_v57  ;;  %s4148_s29 = smov 104   ;;  %s4149_s23 = smov 72   ;;  %vm3143_vm15 = vcmask 523264   ;;  %vm3203_vm0 = vcmask 257024  }
  0x23   : > { %625 = vadd.xlane.f32.xlu1 %v624_v13  ;;  %622 = vadd.xlane.f32.xlu0 %v621_v14  ;;  %s4150_s12 = smov 100   ;;  %s4151_s20 = smov 68  }
  0x24   : > { %p3474_p6 = scmp.ne.s32.totalorder %s4125_s21, 1 }
  0x25   : > { %vm3208_vm1 = vcmask (!%p3474_p6), 261124  }
  0xab   : > { %v620_v15 = vpop.xlane.xlu0 %619 }
  0xac   : > { %v628_v16 = vmul.f32 0.03125, %v620_v15 }
  0xae   : > { %v631_v17 = vsub.f32 %v601_v4, %v628_v16 }
  0xb0   : > { %v626_v18 = vpop.xlane.xlu1 %625  ;;  %v623_v20 = vpop.xlane.xlu0 %622  ;;  %v634_v22 = vmul.f32 %v631_v17, %v631_v17 }
  0xb1   : > { %v630_v19 = vmul.f32 0.03125, %v626_v18  ;;  %v629_v21 = vmul.f32 0.03125, %v623_v20 }
  0xb2   : > { %v637_v25 = vsel %vm617_vm2, %v634_v22, 0.0 }
  0xb3   : > { %v633_v23 = vsub.f32 %v4324_v11, %v630_v19  ;;  %v632_v24 = vsub.f32 %v4327_v12, %v629_v21  ;;  %638 = vadd.xlane.f32.xlu1 %v637_v25 }
  0xb5   : > { %v636_v26 = vmul.f32 %v633_v23, %v633_v23  ;;  %v635_v27 = vmul.f32 %v632_v24, %v632_v24 }
  0xb7   : > { %v643_v28 = vsel %vm617_vm2, %v636_v26, 0.0  ;;  %v640_v29 = vsel %vm617_vm2, %v635_v27, 0.0 }
  0xb8   : > { %644 = vadd.xlane.f32.xlu1 %v643_v28  ;;  %641 = vadd.xlane.f32.xlu0 %v640_v29 }
 0x140   : > { %v639_v32 = vpop.xlane.xlu1 %638 }
 0x141   : > { %v646_v33 = vmul.f32 0.03125, %v639_v32 }
 0x143   : > { %v649_v34 = vadd.f32 1e-05, %v646_v33 }
 0x145   : > { %v645_v35 = vpop.xlane.xlu1 %644  ;;  %v642_v36 = vpop.xlane.xlu0 %641  ;;  %3940 = vrsqrt.f32 %v649_v34 }
 0x146   : > { %v648_v37 = vmul.f32 0.03125, %v645_v35  ;;  %v647_v38 = vmul.f32 0.03125, %v642_v36 }
 0x148   : > { %v651_v39 = vadd.f32 1e-05, %v648_v37  ;;  %v650_v40 = vadd.f32 1e-05, %v647_v38 }
 0x14a   : > { %3942 = vrsqrt.f32 %v651_v39 }
 0x14b   : > { %3944 = vrsqrt.f32 %v650_v40 }
 0x14f   : > { %v3941_v41 = vpop.eup %3940 }
 0x150   : > { %v655_v42 = vmul.f32 %v3941_v41, %v631_v17 }
 0x152   : > { %v665_v48 = vmul.f32 %v3417_v43, %v655_v42 }
 0x154   : > { %v3943_v44 = vpop.eup %3942  ;;  %v675_v53 = vadd.f32 %v3418_v49, %v665_v48 }
 0x155   : > { %v3945_v45 = vpop.eup %3944  ;;  %v657_v46 = vmul.f32 %v3943_v44, %v633_v23 }
 0x156   : > { %v656_v47 = vmul.f32 %v3945_v45, %v632_v24 }
 0x157   : > { %v667_v50 = vmul.f32 %v3417_v43, %v657_v46 }
 0x158   : > { %v666_v51 = vmul.f32 %v3417_v43, %v656_v47 }
 0x159   : > { %v677_v52 = vadd.f32 %v3418_v49, %v667_v50 }
 0x15a   : > { %v676_v54 = vadd.f32 %v3418_v49, %v666_v51 }
 0x15b   : > { %v679_v55 = vpack.c.bf16 %v677_v52, %v677_v52 }
 0x15c   : > { %v678_v56 = vpack.c.bf16 %v676_v54, %v675_v53 }
 0x15e   : > { %3572 = vmatprep.mubr.msk.bf16.mxu0 %vm617_vm2, %v678_v56 }
 0x15f   : > { %3573 = vmatmul.mubr.msk.bf16.vlgmr.msra.gmra.mrb[0].mxu0 %vm617_vm2, %v679_v55 }
 0x160   : > { %3584 = vmatprep.mubr.msk.bf16.mxu0 %vm4136_vm4, %v4135_v57 }
 0x232   : > { %v3574_v58 = vpop.f32.mrb[0].mxu0 }
 0x233   : > { %v736_v59 = vpop.f32.mrb[1].mxu0  ;;  %v751_v63 = vpack.c.bf16 %v3574_v58, %v3574_v58 }
 0x234   : > { %v3575_v60 = vpop.f32.mrb[2].mxu0 }
 0x235   : > { %v739_v61 = vpop.f32.mrb[3].mxu0  ;;  %v1817_v1 = vrot.slane %v751_v63, 6 }
 0x236   : > { %v4358_v62 = vpack.c.bf16 %v739_v61, %v736_v59 }
 0x238   : > { %880 = vrot.lane.b32.xlu1 %v4358_v62, %s4137_s27  ;;  %753 = vrot.lane.b32.xlu0 %v4358_v62, %s4138_s2  ;;  %v1816_v0 = vrot.slane %v4358_v62, 6 }
 0x23a   : > { %v4381_v2 = vsel %vm1815_vm5, %v1816_v0, %v1817_v1 }
 0x23c   : > { %878 = vrot.lane.b32.xlu1 %v4358_v62, %s4139_s13  ;;  %1001 = vrot.lane.b32.xlu0 %v4358_v62, %s4140_s14 }
 0x240   : > { %1003 = vrot.lane.b32.xlu1 %v4358_v62, %s4141_s16  ;;  %1124 = vrot.lane.b32.xlu0 %v4358_v62, %s4142_s24 }
 0x244   : > { %1126 = vrot.lane.b32.xlu1 %v4358_v62, %s4143_s19  ;;  %1247 = vrot.lane.b32.xlu0 %v4358_v62, %s4144_s15 }
 0x248   : > { %1249 = vrot.lane.b32.xlu1 %v4358_v62, %s4145_s22  ;;  %1370 = vrot.lane.b32.xlu0 %v4358_v62, %s4146_s25 }
 0x24c   : > { %1372 = vrot.lane.b32.xlu1 %v4358_v62, %s4147_s28  ;;  %1493 = vrot.lane.b32.xlu0 %v4358_v62, %s4148_s29 }
 0x250   : > { %1495 = vrot.lane.b32.xlu1 %v4358_v62, %s4149_s23  ;;  %1616 = vrot.lane.b32.xlu0 %v4358_v62, %s4150_s12 }
 0x254   : > { %1618 = vrot.lane.b32.xlu1 %v4358_v62, %s4151_s20  ;;  %1942 = vrot.lane.b32.xlu0 %v4381_v2, %s4137_s27  ;;  %s4152_s27 = smov 64  }
 0x258   : > { %2065 = vrot.lane.b32.xlu0 %v4381_v2, %s4141_s16  ;;  %1819 = vrot.lane.b32.xlu1 %v4381_v2, %s4138_s2  ;;  %s4153_s2 = smov 56   ;;  %s4157_s16 = smov 48  }
 0x25c   : > { %2188 = vrot.lane.b32.xlu0 %v4381_v2, %s4143_s19  ;;  %1940 = vrot.lane.b32.xlu1 %v4381_v2, %s4139_s13  ;;  %s4154_s13 = smov 52   ;;  %s4160_s19 = smov 4  }
 0x260   : > { %2311 = vrot.lane.b32.xlu0 %v4381_v2, %s4145_s22  ;;  %2063 = vrot.lane.b32.xlu1 %v4381_v2, %s4140_s14  ;;  %s4155_s14 = smov 60   ;;  %s4162_s22 = smov 12  }
 0x264   : > { %2434 = vrot.lane.b32.xlu0 %v4381_v2, %s4147_s28  ;;  %2186 = vrot.lane.b32.xlu1 %v4381_v2, %s4142_s24  ;;  %s4158_s24 = smov 36   ;;  %s4164_s28 = smov 20  }
 0x268   : > { %2557 = vrot.lane.b32.xlu0 %v4381_v2, %s4149_s23  ;;  %2309 = vrot.lane.b32.xlu1 %v4381_v2, %s4144_s15  ;;  %s4161_s15 = smov 8   ;;  %s4166_s23 = smov 28  }
 0x26c   : > { %2680 = vrot.lane.b32.xlu0 %v4381_v2, %s4151_s20  ;;  %2432 = vrot.lane.b32.xlu1 %v4381_v2, %s4146_s25  ;;  %s4156_s20 = smov 44   ;;  %s4163_s25 = smov 16  }
 0x270   : > { %828 = vrot.lane.b32.xlu0 %v4358_v62, %s4152_s27  ;;  %2555 = vrot.lane.b32.xlu1 %v4381_v2, %s4148_s29  ;;  %s4165_s29 = smov 24  }
 0x274   : > { %1075 = vrot.lane.b32.xlu0 %v4358_v62, %s4153_s2  ;;  %2678 = vrot.lane.b32.xlu1 %v4381_v2, %s4150_s12  ;;  %s4159_s12 = smov 40  }
 0x278   : > { %1198 = vrot.lane.b32.xlu0 %v4358_v62, %s4154_s13  ;;  %952 = vrot.lane.b32.xlu1 %v4358_v62, %s4155_s14 }
 0x27c   : > { %1444 = vrot.lane.b32.xlu0 %v4358_v62, %s4156_s20  ;;  %1321 = vrot.lane.b32.xlu1 %v4358_v62, %s4157_s16 }
 0x280   : > { %1690 = vrot.lane.b32.xlu0 %v4358_v62, %s4158_s24  ;;  %1567 = vrot.lane.b32.xlu1 %v4358_v62, %s4159_s12 }
 0x284   : > { %1891 = vrot.lane.b32.xlu1 %v4381_v2, %s4152_s27 }
 0x2aa   : > { %v754_v3 = vpop.permute.xlu0 %753  ;;  %v881_v5 = vpop.permute.xlu1 %880 }
 0x2ab   : > { %v760_v4 = vsel %vm755_vm6, %v754_v3, 0  ;;  %v886_v9 = vsel %vm755_vm6, %v881_v5, 0 }
 0x2ac   : > { %3577 = vmatpush3.bf16.xpose.msra.mxu1 %v760_v4 }
 0x2ad   : > { %3588 = vmatprep.subr.bf16.mxu1 %v4135_v57 }
 0x2ae   : > { %v1002_v6 = vpop.permute.xlu0 %1001  ;;  %v879_v7 = vpop.permute.xlu1 %878 }
 0x2b2   : > { %v1125_v8 = vpop.permute.xlu0 %1124  ;;  %v1004_v13 = vpop.permute.xlu1 %1003 }
 0x2b3   : > { %3579 = vmatmul.mubr.msk.bf16.vlgmr.msra.gmra.mrb[0].mxu1 %vm755_vm6, %v4358_v62  ;;  %v1009_v15 = vsel %vm755_vm6, %v1004_v13, 0 }
 0x2b4   : > { %3589 = vmatpush3.bf16.xpose.msra.mxu1 %v886_v9  ;;  %3590 = vmatprep.mubr.msk.bf16.mxu1 %vm4136_vm4, %v4135_v57 }
 0x2b5   : > { %3600 = vmatprep.subr.bf16.mxu1 %v4135_v57 }
 0x2b6   : > { %v1248_v10 = vpop.permute.xlu0 %1247  ;;  %v1127_v17 = vpop.permute.xlu1 %1126 }
 0x2b7   : > { %v1132_v19 = vsel %vm755_vm6, %v1127_v17, 0 }
 0x2ba   : > { %v1371_v14 = vpop.permute.xlu0 %1370  ;;  %v1250_v21 = vpop.permute.xlu1 %1249 }
 0x2bb   : > { %3591 = vmatmul.mubr.msk.bf16.vlgmr.msra.gmra.mrb[4].mxu1 %vm755_vm6, %v879_v7  ;;  %v1255_v23 = vsel %vm755_vm6, %v1250_v21, 0 }
 0x2bc   : > { %3601 = vmatpush3.bf16.xpose.msra.mxu1 %v1009_v15  ;;  %3602 = vmatprep.mubr.msk.bf16.mxu1 %vm4136_vm4, %v4135_v57 }
 0x2bd   : > { %3612 = vmatprep.subr.bf16.mxu1 %v4135_v57 }
 0x2be   : > { %v1494_v16 = vpop.permute.xlu0 %1493  ;;  %v1373_v25 = vpop.permute.xlu1 %1372 }
 0x2bf   : > { %v1378_v27 = vsel %vm755_vm6, %v1373_v25, 0 }
 0x2c2   : > { %v1617_v18 = vpop.permute.xlu0 %1616  ;;  %v1496_v29 = vpop.permute.xlu1 %1495 }
 0x2c3   : > { %3603 = vmatmul.mubr.msk.bf16.vlgmr.msra.gmra.mrb[8].mxu1 %vm755_vm6, %v1002_v6  ;;  %v1501_v31 = vsel %vm755_vm6, %v1496_v29, 0 }
 0x2c4   : > { %3613 = vmatpush3.bf16.xpose.msra.mxu1 %v1132_v19  ;;  %3614 = vmatprep.mubr.msk.bf16.mxu1 %vm4136_vm4, %v4135_v57 }
 0x2c5   : > { %3624 = vmatprep.subr.bf16.mxu1 %v4135_v57 }
 0x2c6   : > { %v1943_v20 = vpop.permute.xlu0 %1942  ;;  %v1619_v33 = vpop.permute.xlu1 %1618 }
 0x2c7   : > { %v1624_v35 = vsel %vm755_vm6, %v1619_v33, 0  ;;  %v1948_v39 = vsel %vm755_vm6, %v1943_v20, 0 }
 0x2ca   : > { %v2066_v22 = vpop.permute.xlu0 %2065  ;;  %v1820_v37 = vpop.permute.xlu1 %1819 }
 0x2cb   : > { %3615 = vmatmul.mubr.msk.bf16.vlgmr.msra.gmra.mrb[12].mxu1 %vm755_vm6, %v1125_v8  ;;  %v1825_v38 = vsel %vm755_vm6, %v1820_v37, 0  ;;  %v2071_v41 = vsel %vm755_vm6, %v2066_v22, 0 }
 0x2cc   : > { %3625 = vmatpush3.bf16.xpose.msra.mxu1 %v1255_v23  ;;  %3626 = vmatprep.mubr.msk.bf16.mxu1 %vm4136_vm4, %v4135_v57 }
 0x2cd   : > { %3636 = vmatprep.subr.bf16.mxu1 %v4135_v57 }
 0x2ce   : > { %v2189_v24 = vpop.permute.xlu0 %2188  ;;  %v1941_v40 = vpop.permute.xlu1 %1940 }
 0x2cf   : > { %v2194_v43 = vsel %vm755_vm6, %v2189_v24, 0 }
 0x2d2   : > { %v2312_v26 = vpop.permute.xlu0 %2311  ;;  %v2064_v42 = vpop.permute.xlu1 %2063 }
 0x2d3   : > { %3627 = vmatmul.mubr.msk.bf16.vlgmr.msra.gmra.mrb[16].mxu1 %vm755_vm6, %v1248_v10  ;;  %v2317_v45 = vsel %vm755_vm6, %v2312_v26, 0 }
 0x2d4   : > { %3637 = vmatpush3.bf16.xpose.msra.mxu1 %v1378_v27  ;;  %3638 = vmatprep.mubr.msk.bf16.mxu1 %vm4136_vm4, %v4135_v57 }
 0x2d5   : > { %3648 = vmatprep.subr.bf16.mxu1 %v4135_v57 }
 0x2d6   : > { %v2435_v28 = vpop.permute.xlu0 %2434  ;;  %v2187_v44 = vpop.permute.xlu1 %2186 }
 0x2d7   : > { %v2440_v47 = vsel %vm755_vm6, %v2435_v28, 0 }
 0x2da   : > { %v2558_v30 = vpop.permute.xlu0 %2557  ;;  %v2310_v46 = vpop.permute.xlu1 %2309 }
 0x2db   : > { %3639 = vmatmul.mubr.msk.bf16.vlgmr.msra.gmra.mrb[20].mxu1 %vm755_vm6, %v1371_v14  ;;  %v2563_v49 = vsel %vm755_vm6, %v2558_v30, 0 }
 0x2dc   : > { %3649 = vmatpush3.bf16.xpose.msra.mxu1 %v1501_v31  ;;  %3650 = vmatprep.mubr.msk.bf16.mxu1 %vm4136_vm4, %v4135_v57 }
 0x2dd   : > { %3660 = vmatprep.subr.bf16.mxu1 %v4135_v57 }
 0x2de   : > { %v2681_v32 = vpop.permute.xlu0 %2680  ;;  %v2433_v48 = vpop.permute.xlu1 %2432 }
 0x2df   : > { %v2686_v51 = vsel %vm755_vm6, %v2681_v32, 0 }
 0x2e2   : > { %v829_v34 = vpop.permute.xlu0 %828  ;;  %v2556_v50 = vpop.permute.xlu1 %2555 }
 0x2e3   : > { %v835_v36 = vsel %vm833_vm7, %v829_v34, 0  ;;  %3651 = vmatmul.mubr.msk.bf16.vlgmr.msra.gmra.mrb[24].mxu1 %vm755_vm6, %v1494_v16 }
 0x2e4   : > { %3583 = vmatpush3.bf16.msra.mxu0 %v835_v36  ;;  %3661 = vmatpush3.bf16.xpose.msra.mxu1 %v1624_v35 }
 0x2e5   : > { %3662 = vmatprep.mubr.msk.bf16.mxu1 %vm4136_vm4, %v4135_v57  ;;  %3672 = vmatprep.subr.bf16.mxu1 %v4135_v57 }
 0x2e6   : > { %3594 = vmatprep.subr.bf16.mxu0 %v4135_v57  ;;  %v2679_v52 = vpop.permute.xlu1 %2678 }
 0x2eb   : > { %3663 = vmatmul.mubr.msk.bf16.vlgmr.msra.gmra.mrb[28].mxu1 %vm755_vm6, %v1617_v18 }
 0x2ec   : > { %3673 = vmatpush3.bf16.xpose.msra.mxu1 %v1825_v38  ;;  %3674 = vmatprep.mubr.msk.bf16.mxu1 %vm4136_vm4, %v4135_v57 }
 0x2ed   : > { %3684 = vmatprep.subr.bf16.mxu1 %v4135_v57 }
 0x2f3   : > { %3675 = vmatmul.mubr.msk.bf16.vlgmr.msra.gmra.mrb[32].mxu1 %vm755_vm6, %v4381_v2 }
 0x2f4   : > { %3685 = vmatpush3.bf16.xpose.msra.mxu1 %v1948_v39  ;;  %3686 = vmatprep.mubr.msk.bf16.mxu1 %vm4136_vm4, %v4135_v57 }
 0x2f5   : > { %3696 = vmatprep.subr.bf16.mxu1 %v4135_v57 }
 0x2fb   : > { %3687 = vmatmul.mubr.msk.bf16.vlgmr.msra.gmra.mrb[36].mxu1 %vm755_vm6, %v1941_v40 }
 0x2fc   : > { %3697 = vmatpush3.bf16.xpose.msra.mxu1 %v2071_v41  ;;  %3698 = vmatprep.mubr.msk.bf16.mxu1 %vm4136_vm4, %v4135_v57 }
 0x2fd   : > { %3708 = vmatprep.subr.bf16.mxu1 %v4135_v57 }
 0x303   : > { %3699 = vmatmul.mubr.msk.bf16.vlgmr.msra.gmra.mrb[40].mxu1 %vm755_vm6, %v2064_v42 }
 0x304   : > { %3709 = vmatpush3.bf16.xpose.msra.mxu1 %v2194_v43  ;;  %3710 = vmatprep.mubr.msk.bf16.mxu1 %vm4136_vm4, %v4135_v57 }
 0x305   : > { %3720 = vmatprep.subr.bf16.mxu1 %v4135_v57 }
 0x30b   : > { %3711 = vmatmul.mubr.msk.bf16.vlgmr.msra.gmra.mrb[44].mxu1 %vm755_vm6, %v2187_v44 }
 0x30c   : > { %3721 = vmatpush3.bf16.xpose.msra.mxu1 %v2317_v45  ;;  %3722 = vmatprep.mubr.msk.bf16.mxu1 %vm4136_vm4, %v4135_v57 }
 0x30d   : > { %3732 = vmatprep.subr.bf16.mxu1 %v4135_v57 }
 0x313   : > { %3723 = vmatmul.mubr.msk.bf16.vlgmr.msra.gmra.mrb[48].mxu1 %vm755_vm6, %v2310_v46 }
 0x314   : > { %3733 = vmatpush3.bf16.xpose.msra.mxu1 %v2440_v47  ;;  %3734 = vmatprep.mubr.msk.bf16.mxu1 %vm4136_vm4, %v4135_v57 }
 0x315   : > { %3744 = vmatprep.subr.bf16.mxu1 %v4135_v57 }
 0x31b   : > { %3735 = vmatmul.mubr.msk.bf16.vlgmr.msra.gmra.mrb[52].mxu1 %vm755_vm6, %v2433_v48 }
 0x31c   : > { %3745 = vmatpush3.bf16.xpose.msra.mxu1 %v2563_v49  ;;  %3746 = vmatprep.mubr.msk.bf16.mxu1 %vm4136_vm4, %v4135_v57 }
 0x31d   : > { %3756 = vmatprep.subr.bf16.mxu1 %v4135_v57 }
 0x323   : > { %3747 = vmatmul.mubr.msk.bf16.vlgmr.msra.gmra.mrb[56].mxu1 %vm755_vm6, %v2556_v50 }
 0x324   : > { %3757 = vmatpush3.bf16.xpose.msra.mxu1 %v2686_v51  ;;  %3758 = vmatprep.mubr.msk.bf16.mxu1 %vm4136_vm4, %v4135_v57 }
 0x32b   : > { %3759 = vmatmul.mubr.msk.bf16.vlgmr.msra.gmra.mrb[60].mxu1 %vm755_vm6, %v2679_v52 }
 0x386   : > { %v4502_v53 = vpop.f32.mrb[0].mxu1 }
 0x387   : > { %v3580_v54 = vpop.f32.mrb[1].mxu1  ;;  %v804_v55 = vsel %vm803_vm8, %v4502_v53, -inf }
 0x388   : > { %v4506_v56 = vpop.f32.mrb[2].mxu1  ;;  %805 = vmax.xlane.f32.xlu0 %v804_v55 }
 0x389   : > { %v3581_v58 = vpop.f32.mrb[3].mxu1  ;;  %v808_v59 = vsel %vm807_vm9, %v4506_v56, -inf }
 0x38a   : > { %809 = vmax.xlane.f32.xlu1 %v808_v59 }
 0x38e   : > { %v4510_v60 = vpop.f32.mrb[4].mxu1 }
 0x38f   : > { %v3592_v61 = vpop.f32.mrb[5].mxu1  ;;  %v929_v62 = vsel %vm803_vm8, %v4510_v60, -inf }
 0x390   : > { %v4514_v63 = vpop.f32.mrb[6].mxu1  ;;  %930 = vmax.xlane.f32.xlu0 %v929_v62 }
 0x391   : > { %v3593_v0 = vpop.f32.mrb[7].mxu1  ;;  %v932_v1 = vsel %vm807_vm9, %v4514_v63, -inf }
 0x394   : > { %933 = vmax.xlane.f32.xlu0 %v932_v1 }
 0x396   : > { %v4518_v3 = vpop.f32.mrb[8].mxu1 }
 0x397   : > { %v3604_v4 = vpop.f32.mrb[9].mxu1  ;;  %v1052_v5 = vsel %vm803_vm8, %v4518_v3, -inf }
 0x398   : > { %v4522_v6 = vpop.f32.mrb[10].mxu1  ;;  %1053 = vmax.xlane.f32.xlu0 %v1052_v5 }
 0x399   : > { %v3605_v7 = vpop.f32.mrb[11].mxu1  ;;  %v1055_v8 = vsel %vm807_vm9, %v4522_v6, -inf }
 0x39a   : > { %1056 = vmax.xlane.f32.xlu1 %v1055_v8 }
 0x39e   : > { %v4526_v9 = vpop.f32.mrb[12].mxu1 }
 0x39f   : > { %v3616_v10 = vpop.f32.mrb[13].mxu1  ;;  %v1175_v13 = vsel %vm803_vm8, %v4526_v9, -inf }
 0x3a0   : > { %v4530_v14 = vpop.f32.mrb[14].mxu1  ;;  %1176 = vmax.xlane.f32.xlu0 %v1175_v13 }
 0x3a1   : > { %v3617_v15 = vpop.f32.mrb[15].mxu1  ;;  %v1178_v16 = vsel %vm807_vm9, %v4530_v14, -inf }
 0x3a2   : > { %1179 = vmax.xlane.f32.xlu1 %v1178_v16 }
 0x3a6   : > { %v4534_v17 = vpop.f32.mrb[16].mxu1 }
 0x3a7   : > { %v3628_v18 = vpop.f32.mrb[17].mxu1  ;;  %v1298_v19 = vsel %vm803_vm8, %v4534_v17, -inf }
 0x3a8   : > { %v4538_v20 = vpop.f32.mrb[18].mxu1  ;;  %1299 = vmax.xlane.f32.xlu0 %v1298_v19 }
 0x3a9   : > { %v3629_v21 = vpop.f32.mrb[19].mxu1  ;;  %v1301_v22 = vsel %vm807_vm9, %v4538_v20, -inf }
 0x3aa   : > { %1302 = vmax.xlane.f32.xlu1 %v1301_v22 }
 0x3ae   : > { %v4542_v23 = vpop.f32.mrb[20].mxu1 }
 0x3af   : > { %v3640_v24 = vpop.f32.mrb[21].mxu1  ;;  %v1421_v25 = vsel %vm803_vm8, %v4542_v23, -inf }
 0x3b0   : > { %v4546_v26 = vpop.f32.mrb[22].mxu1  ;;  %1422 = vmax.xlane.f32.xlu0 %v1421_v25 }
 0x3b1   : > { %v3641_v27 = vpop.f32.mrb[23].mxu1  ;;  %v1424_v28 = vsel %vm807_vm9, %v4546_v26, -inf }
 0x3b2   : > { %1425 = vmax.xlane.f32.xlu1 %v1424_v28 }
 0x3b6   : > { %v4550_v29 = vpop.f32.mrb[24].mxu1 }
 0x3b7   : > { %v3652_v30 = vpop.f32.mrb[25].mxu1  ;;  %v1544_v31 = vsel %vm803_vm8, %v4550_v29, -inf }
 0x3b8   : > { %v4554_v32 = vpop.f32.mrb[26].mxu1  ;;  %1545 = vmax.xlane.f32.xlu0 %v1544_v31 }
 0x3b9   : > { %v3653_v33 = vpop.f32.mrb[27].mxu1  ;;  %v1547_v34 = vsel %vm807_vm9, %v4554_v32, -inf }
 0x3ba   : > { %1548 = vmax.xlane.f32.xlu1 %v1547_v34 }
 0x3be   : > { %v4558_v35 = vpop.f32.mrb[28].mxu1 }
 0x3bf   : > { %v3664_v36 = vpop.f32.mrb[29].mxu1  ;;  %v1667_v37 = vsel %vm803_vm8, %v4558_v35, -inf }
 0x3c0   : > { %v4562_v38 = vpop.f32.mrb[30].mxu1  ;;  %1668 = vmax.xlane.f32.xlu0 %v1667_v37 }
 0x3c1   : > { %v3665_v39 = vpop.f32.mrb[31].mxu1  ;;  %v1670_v40 = vsel %vm807_vm9, %v4562_v38, -inf }
 0x3c2   : > { %1671 = vmax.xlane.f32.xlu1 %v1670_v40  ;;  %v4624_v40 = vpop.permute.xlu0 %1075 }
 0x3c6   : > { %v4566_v41 = vpop.f32.mrb[32].mxu1 }
 0x3c7   : > { %v3676_v42 = vpop.f32.mrb[33].mxu1  ;;  %v1868_v43 = vsel %vm803_vm8, %v4566_v41, -inf }
 0x3c8   : > { %1869 = vmax.xlane.f32.xlu0 %v1868_v43  ;;  %v4570_v44 = vpop.f32.mrb[34].mxu1 }
 0x3c9   : > { %v3677_v45 = vpop.f32.mrb[35].mxu1  ;;  %v1871_v46 = vsel %vm807_vm9, %v4570_v44, -inf }
 0x3ca   : > { %1872 = vmax.xlane.f32.xlu1 %v1871_v46  ;;  %v4630_v46 = vpop.permute.xlu1 %952 }
 0x3ce   : > { %v4574_v47 = vpop.f32.mrb[36].mxu1 }
 0x3cf   : > { %v3688_v48 = vpop.f32.mrb[37].mxu1  ;;  %v1991_v49 = vsel %vm803_vm8, %v4574_v47, -inf }
 0x3d0   : > { %1992 = vmax.xlane.f32.xlu0 %v1991_v49  ;;  %v4578_v50 = vpop.f32.mrb[38].mxu1 }
 0x3d1   : > { %v3689_v51 = vpop.f32.mrb[39].mxu1  ;;  %v1994_v52 = vsel %vm807_vm9, %v4578_v50, -inf }
 0x3d2   : > { %1995 = vmax.xlane.f32.xlu1 %v1994_v52  ;;  %v4634_v51 = vpop.permute.xlu0 %1198  ;;  %v4636_v52 = vpop.permute.xlu1 %1321 }
 0x3d6   : > { %v4582_v54 = vpop.f32.mrb[40].mxu1 }
 0x3d7   : > { %v3700_v55 = vpop.f32.mrb[41].mxu1  ;;  %v2114_v58 = vsel %vm803_vm8, %v4582_v54, -inf }
 0x3d8   : > { %2115 = vmax.xlane.f32.xlu0 %v2114_v58  ;;  %v4586_v59 = vpop.f32.mrb[42].mxu1  ;;  %v4638_v55 = vpop.permute.xlu0 %1444 }
 0x3d9   : > { %v3701_v61 = vpop.f32.mrb[43].mxu1  ;;  %v2117_v62 = vsel %vm807_vm9, %v4586_v59, -inf  ;;  %v4640_v58 = vpop.permute.xlu1 %1567 }
 0x3da   : > { %2118 = vmax.xlane.f32.xlu1 %v2117_v62 }
 0x3dc   : > { %v4642_v61 = vpop.permute.xlu0 %1690 }
 0x3dd   : > { %v4644_v62 = vpop.permute.xlu1 %1891 }
 0x3de   : > { %v4590_v0 = vpop.f32.mrb[44].mxu1 }
 0x3df   : > { %v3712_v1 = vpop.f32.mrb[45].mxu1  ;;  %v2237_v4 = vsel %vm803_vm8, %v4590_v0, -inf }
 0x3e0   : > { %2238 = vmax.xlane.f32.xlu0 %v2237_v4  ;;  %v4594_v5 = vpop.f32.mrb[46].mxu1 }
 0x3e1   : > { %v3713_v7 = vpop.f32.mrb[47].mxu1  ;;  %v2240_v8 = vsel %vm807_vm9, %v4594_v5, -inf }
 0x3e2   : > { %2241 = vmax.xlane.f32.xlu1 %v2240_v8 }
 0x3e6   : > { %v4598_v10 = vpop.f32.mrb[48].mxu1 }
 0x3e7   : > { %v3724_v13 = vpop.f32.mrb[49].mxu1  ;;  %v2360_v15 = vsel %vm803_vm8, %v4598_v10, -inf }
 0x3e8   : > { %2361 = vmax.xlane.f32.xlu0 %v2360_v15  ;;  %v4602_v16 = vpop.f32.mrb[50].mxu1 }
 0x3e9   : > { %v3725_v18 = vpop.f32.mrb[51].mxu1  ;;  %v2363_v19 = vsel %vm807_vm9, %v4602_v16, -inf }
 0x3ea   : > { %2364 = vmax.xlane.f32.xlu1 %v2363_v19 }
 0x3ee   : > { %v4606_v21 = vpop.f32.mrb[52].mxu1 }
 0x3ef   : > { %v3736_v22 = vpop.f32.mrb[53].mxu1  ;;  %v2483_v24 = vsel %vm803_vm8, %v4606_v21, -inf }
 0x3f0   : > { %2484 = vmax.xlane.f32.xlu0 %v2483_v24  ;;  %v4610_v25 = vpop.f32.mrb[54].mxu1 }
 0x3f1   : > { %v3737_v27 = vpop.f32.mrb[55].mxu1  ;;  %v2486_v28 = vsel %vm807_vm9, %v4610_v25, -inf }
 0x3f2   : > { %2487 = vmax.xlane.f32.xlu1 %v2486_v28 }
 0x3f6   : > { %v4614_v30 = vpop.f32.mrb[56].mxu1 }
 0x3f7   : > { %v3748_v31 = vpop.f32.mrb[57].mxu1  ;;  %v2606_v33 = vsel %vm803_vm8, %v4614_v30, -inf }
 0x3f8   : > { %2607 = vmax.xlane.f32.xlu0 %v2606_v33  ;;  %v4618_v34 = vpop.f32.mrb[58].mxu1 }
 0x3f9   : > { %v3749_v36 = vpop.f32.mrb[59].mxu1  ;;  %v2609_v37 = vsel %vm807_vm9, %v4618_v34, -inf }
 0x3fa   : > { %2610 = vmax.xlane.f32.xlu1 %v2609_v37 }
 0x3fe   : > { %v4622_v39 = vpop.f32.mrb[60].mxu1 }
 0x3ff   : > { %v3760_v42 = vpop.f32.mrb[61].mxu1  ;;  %v2729_v43 = vsel %vm803_vm8, %v4622_v39, -inf }
 0x400   : > { %2730 = vmax.xlane.f32.xlu1 %v2729_v43  ;;  %v4628_v45 = vpop.f32.mrb[62].mxu1 }
 0x401   : > { %v3761_v48 = vpop.f32.mrb[63].mxu1  ;;  %v2732_v49 = vsel %vm807_vm9, %v4628_v45, -inf }
 0x404   : > { %2733 = vmax.xlane.f32.xlu1 %v2732_v49 }
 0x415   : > { %v806_v1 = vpop.xlane.xlu0 %805 }
 0x416   : > { %v811_v4 = vsub.f32 %v4502_v53, %v806_v1 }
 0x417   : > { %v810_v7 = vpop.xlane.xlu1 %809 }
 0x418   : > { %v813_v8 = vmul.f32 1.442695, %v811_v4  ;;  %v812_v13 = vsub.f32 %v4506_v56, %v810_v7 }
 0x41a   : > { %3946 = vpow2.f32 %v813_v8  ;;  %v815_v15 = vmul.f32 1.442695, %v812_v13 }
 0x41c   : > { %3948 = vpow2.f32 %v815_v15 }
 0x41d   : > { %v931_v18 = vpop.xlane.xlu0 %930 }
 0x41e   : > { %v935_v19 = vsub.f32 %v4510_v60, %v931_v18 }
 0x420   : > { %v937_v22 = vmul.f32 1.442695, %v935_v19 }
 0x421   : > { %v934_v24 = vpop.xlane.xlu0 %933 }
 0x422   : > { %3950 = vpow2.f32 %v937_v22  ;;  %v936_v27 = vsub.f32 %v4514_v63, %v934_v24 }
 0x424   : > { %v4650_v28 = vpop.eup %3946  ;;  %v939_v31 = vmul.f32 1.442695, %v936_v27 }
 0x425   : > { %v1054_v33 = vpop.xlane.xlu0 %1053  ;;  %v817_v53 = vsel %vm803_vm8, %v4650_v28, 0.0 }
 0x426   : > { %v4654_v36 = vpop.eup %3948  ;;  %3952 = vpow2.f32 %v939_v31  ;;  %v1058_v56 = vsub.f32 %v4518_v3, %v1054_v33  ;;  %818 = vadd.xlane.f32.xlu0 %v817_v53 }
 0x427   : > { %v1057_v37 = vpop.xlane.xlu1 %1056  ;;  %v820_v60 = vsel %vm807_vm9, %v4654_v36, 0.0 }
 0x428   : > { %v1060_v42 = vmul.f32 1.442695, %v1058_v56  ;;  %v1059_v63 = vsub.f32 %v4522_v6, %v1057_v37  ;;  %821 = vadd.xlane.f32.xlu1 %v820_v60 }
 0x42a   : > { %3954 = vpow2.f32 %v1060_v42  ;;  %v1062_v43 = vmul.f32 1.442695, %v1059_v63 }
 0x42c   : > { %v4660_v48 = vpop.eup %3950  ;;  %3956 = vpow2.f32 %v1062_v43 }
 0x42d   : > { %v1177_v49 = vpop.xlane.xlu0 %1176  ;;  %v941_v1 = vsel %vm803_vm8, %v4660_v48, 0.0 }
 0x42e   : > { %v1181_v3 = vsub.f32 %v4526_v9, %v1177_v49  ;;  %942 = vadd.xlane.f32.xlu0 %v941_v1 }
 0x42f   : > { %v1180_v4 = vpop.xlane.xlu1 %1179 }
 0x430   : > { %v4665_v7 = vpop.eup %3952  ;;  %v1183_v8 = vmul.f32 1.442695, %v1181_v3  ;;  %v1182_v13 = vsub.f32 %v4530_v14, %v1180_v4 }
 0x431   : > { %v944_v6 = vsel %vm807_vm9, %v4665_v7, 0.0 }
 0x432   : > { %3958 = vpow2.f32 %v1183_v8  ;;  %v1185_v15 = vmul.f32 1.442695, %v1182_v13  ;;  %945 = vadd.xlane.f32.xlu1 %v944_v6 }
 0x434   : > { %v4670_v18 = vpop.eup %3954  ;;  %3960 = vpow2.f32 %v1185_v15 }
 0x435   : > { %v1300_v19 = vpop.xlane.xlu0 %1299  ;;  %v1064_v9 = vsel %vm803_vm8, %v4670_v18, 0.0 }
 0x436   : > { %v4674_v22 = vpop.eup %3956  ;;  %v1304_v24 = vsub.f32 %v4534_v17, %v1300_v19  ;;  %1065 = vadd.xlane.f32.xlu0 %v1064_v9 }
 0x437   : > { %v1303_v27 = vpop.xlane.xlu1 %1302  ;;  %v1067_v14 = vsel %vm807_vm9, %v4674_v22, 0.0 }
 0x438   : > { %v1306_v31 = vmul.f32 1.442695, %v1304_v24  ;;  %v1305_v33 = vsub.f32 %v4538_v20, %v1303_v27  ;;  %1068 = vadd.xlane.f32.xlu1 %v1067_v14 }
 0x43a   : > { %3962 = vpow2.f32 %v1306_v31  ;;  %v1308_v53 = vmul.f32 1.442695, %v1305_v33 }
 0x43c   : > { %v4680_v56 = vpop.eup %3958  ;;  %3964 = vpow2.f32 %v1308_v53 }
 0x43d   : > { %v1187_v37 = vsel %vm803_vm8, %v4680_v56, 0.0  ;;  %v1423_v20 = vpop.xlane.xlu0 %1422 }
 0x43e   : > { %v4684_v60 = vpop.eup %3960  ;;  %1188 = vadd.xlane.f32.xlu0 %v1187_v37  ;;  %v1427_v31 = vsub.f32 %v4542_v23, %v1423_v20 }
 0x43f   : > { %v1426_v17 = vpop.xlane.xlu1 %1425  ;;  %v1190_v42 = vsel %vm807_vm9, %v4684_v60, 0.0 }
 0x440   : > { %v1428_v63 = vsub.f32 %v4546_v26, %v1426_v17  ;;  %1191 = vadd.xlane.f32.xlu1 %v1190_v42  ;;  %v1429_v53 = vmul.f32 1.442695, %v1427_v31 }
 0x442   : > { %v1431_v43 = vmul.f32 1.442695, %v1428_v63 }
 0x444   : > { %v4689_v49 = vpop.eup %3962  ;;  %3966 = vpow2.f32 %v1431_v43 }
 0x445   : > { %v1546_v1 = vpop.xlane.xlu0 %1545  ;;  %v1310_v3 = vsel %vm803_vm8, %v4689_v49, 0.0 }
 0x446   : > { %v4693_v4 = vpop.eup %3964  ;;  %v1550_v8 = vsub.f32 %v4550_v29, %v1546_v1  ;;  %1311 = vadd.xlane.f32.xlu1 %v1310_v3 }
 0x447   : > { %v1549_v13 = vpop.xlane.xlu1 %1548  ;;  %v1313_v26 = vsel %vm807_vm9, %v4693_v4, 0.0 }
 0x448   : > { %v1552_v6 = vmul.f32 1.442695, %v1550_v8  ;;  %v1551_v15 = vsub.f32 %v4554_v32, %v1549_v13 }
 0x44a   : > { %3968 = vpow2.f32 %v1552_v6  ;;  %v1554_v19 = vmul.f32 1.442695, %v1551_v15  ;;  %1314 = vadd.xlane.f32.xlu1 %v1313_v26 }
 0x44c   : > { %3970 = vpow2.f32 %v1554_v19 }
 0x44d   : > { %3972 = vpow2.f32 %v1429_v53  ;;  %v1669_v19 = vpop.xlane.xlu0 %1668 }
 0x44e   : > { %v4699_v9 = vpop.eup %3966 }
 0x44f   : > { %v1436_v24 = vsel %vm807_vm9, %v4699_v9, 0.0  ;;  %v1672_v33 = vpop.xlane.xlu1 %1671 }
 0x450   : > { %1437 = vadd.xlane.f32.xlu1 %v1436_v24  ;;  %v1674_v37 = vsub.f32 %v4562_v38, %v1672_v33 }
 0x452   : > { %v1677_v42 = vmul.f32 1.442695, %v1674_v37 }
 0x454   : > { %v4703_v27 = vpop.eup %3968  ;;  %2014 = vrot.lane.b32.xlu0 %v4381_v2, %s4155_s14  ;;  %3974 = vpow2.f32 %v1677_v42  ;;  %s5127_s14 = scalar_lea.vmem %s5106_s6, %s4257_s26 }
 0x455   : > { %v1556_v29 = vsel %vm803_vm8, %v4703_v27, 0.0  ;;  %v1870_v31 = vpop.xlane.xlu0 %1869 }
 0x456   : > { %v4709_v32 = vpop.eup %3970  ;;  %1557 = vadd.xlane.f32.xlu1 %v1556_v29  ;;  %v1874_v42 = vsub.f32 %v4566_v41, %v1870_v31 }
 0x457   : > { %v1559_v14 = vsel %vm807_vm9, %v4709_v32, 0.0  ;;  %v1873_v17 = vpop.xlane.xlu1 %1872  ;;  %v4720_v13 = vpop.eup %3972 }
 0x458   : > { %v1875_v63 = vsub.f32 %v4570_v44, %v1873_v17  ;;  %v1433_v15 = vsel %vm803_vm8, %v4720_v13, 0.0 }
 0x45a   : > { %1560 = vadd.xlane.f32.xlu1 %v1559_v14  ;;  %v1878_v1 = vmul.f32 1.442695, %v1875_v63 }
 0x45c   : > { %3976 = vpow2.f32 %v1878_v1 }
 0x45d   : > { %v1993_v63 = vpop.xlane.xlu0 %1992 }
 0x45e   : > { %v4725_v26 = vpop.eup %3974 }
 0x45f   : > { %v1996_v43 = vpop.xlane.xlu1 %1995  ;;  %v1682_v24 = vsel %vm807_vm9, %v4725_v26, 0.0 }
 0x460   : > { %v1998_v3 = vsub.f32 %v4578_v50, %v1996_v43 }
 0x462   : > { %v2001_v23 = vmul.f32 1.442695, %v1998_v3  ;;  %v1876_v3 = vmul.f32 1.442695, %v1874_v42 }
 0x464   : > { %3978 = vpow2.f32 %v2001_v23 }
 0x465   : > { %v2116_v23 = vpop.xlane.xlu0 %2115 }
 0x467   : > { %v2119_v8 = vpop.xlane.xlu1 %2118 }
 0x468   : > { %v2121_v20 = vsub.f32 %v4586_v59, %v2119_v8  ;;  %v4729_v59 = vpop.eup %3976  ;;  %v1997_v8 = vsub.f32 %v4574_v47, %v1993_v63 }
 0x469   : > { %v1883_v53 = vsel %vm807_vm9, %v4729_v59, 0.0 }
 0x46a   : > { %v2124_v6 = vmul.f32 1.442695, %v2121_v20 }
 0x46b   : > { %2137 = vrot.lane.b32.xlu1 %v4381_v2, %s4153_s2  ;;  %s5126_s2 = scalar_lea.vmem %s5103_s3, %s4257_s26 }
 0x46c   : > { %3980 = vpow2.f32 %v2124_v6  ;;  %v1999_v6 = vmul.f32 1.442695, %v1997_v8 }
 0x46e   : > { %v4735_v37 = vpop.eup %3978 }
 0x46f   : > { %v2242_v38 = vpop.xlane.xlu1 %2241  ;;  %v2006_v43 = vsel %vm807_vm9, %v4735_v37, 0.0 }
 0x470   : > { %v2244_v44 = vsub.f32 %v4594_v5, %v2242_v38  ;;  %v1673_v5 = vsub.f32 %v4558_v35, %v1669_v19 }
 0x472   : > { %v2247_v50 = vmul.f32 1.442695, %v2244_v44  ;;  %v1675_v17 = vmul.f32 1.442695, %v1673_v5  ;;  %v2120_v44 = vsub.f32 %v4582_v54, %v2116_v23 }
 0x473   : > { %1434 = vadd.xlane.f32.xlu0 %v1433_v15  ;;  %v2239_v15 = vpop.xlane.xlu0 %2238 }
 0x474   : > { %3982 = vpow2.f32 %v2247_v50 }
 0x477   : > { %1683 = vadd.xlane.f32.xlu0 %v1682_v24  ;;  %v2365_v29 = vpop.xlane.xlu1 %2364  ;;  %v2122_v24 = vmul.f32 1.442695, %v2120_v44 }
 0x478   : > { %v2367_v14 = vsub.f32 %v4602_v16, %v2365_v29  ;;  %v4740_v16 = vpop.eup %3980  ;;  %v2243_v29 = vsub.f32 %v4590_v0, %v2239_v15 }
 0x479   : > { %v2129_v41 = vsel %vm807_vm9, %v4740_v16, 0.0 }
 0x47a   : > { %v2370_v33 = vmul.f32 1.442695, %v2367_v14  ;;  %v2362_v14 = vpop.xlane.xlu0 %2361 }
 0x47b   : > { %1884 = vadd.xlane.f32.xlu0 %v1883_v53  ;;  %v2366_v53 = vsub.f32 %v4598_v10, %v2362_v14 }
 0x47c   : > { %3984 = vpow2.f32 %v2370_v33  ;;  %v2245_v33 = vmul.f32 1.442695, %v2243_v29 }
 0x47d   : > { %3986 = vpow2.f32 %v1675_v17 }
 0x47e   : > { %v4746_v38 = vpop.eup %3982 }
 0x47f   : > { %2007 = vadd.xlane.f32.xlu0 %v2006_v43  ;;  %v2488_v35 = vpop.xlane.xlu1 %2487  ;;  %v2368_v43 = vmul.f32 1.442695, %v2366_v53 }
 0x480   : > { %v2490_v1 = vsub.f32 %v4610_v25, %v2488_v35  ;;  %v2252_v25 = vsel %vm807_vm9, %v4746_v38, 0.0 }
 0x482   : > { %v2493_v20 = vmul.f32 1.442695, %v2490_v1 }
 0x483   : > { %2130 = vadd.xlane.f32.xlu0 %v2129_v41 }
 0x484   : > { %3988 = vpow2.f32 %v2493_v20 }
 0x485   : > { %3990 = vpow2.f32 %v1876_v3 }
 0x486   : > { %v4751_v50 = vpop.eup %3984  ;;  %3992 = vpow2.f32 %v1999_v6 }
 0x487   : > { %2253 = vadd.xlane.f32.xlu0 %v2252_v25  ;;  %v2611_v47 = vpop.xlane.xlu1 %2610  ;;  %v2375_v31 = vsel %vm807_vm9, %v4751_v50, 0.0  ;;  %v4757_v54 = vpop.eup %3986 }
 0x488   : > { %v2613_v19 = vsub.f32 %v4618_v34, %v2611_v47  ;;  %v2485_v34 = vpop.xlane.xlu0 %2484  ;;  %v1679_v42 = vsel %vm803_vm8, %v4757_v54, 0.0 }
 0x489   : > { %v2489_v35 = vsub.f32 %v4606_v21, %v2485_v34 }
 0x48a   : > { %v2616_v5 = vmul.f32 1.442695, %v2613_v19 }
 0x48b   : > { %2376 = vadd.xlane.f32.xlu0 %v2375_v31  ;;  %v2491_v8 = vmul.f32 1.442695, %v2489_v35 }
 0x48c   : > { %3994 = vpow2.f32 %v2616_v5  ;;  %v2608_v1 = vpop.xlane.xlu0 %2607 }
 0x48d   : > { %3996 = vpow2.f32 %v2122_v24  ;;  %v2612_v23 = vsub.f32 %v4614_v30, %v2608_v1  ;;  %v2731_v41 = vpop.xlane.xlu1 %2730 }
 0x48e   : > { %v4760_v17 = vpop.eup %3988  ;;  %3998 = vpow2.f32 %v2245_v33  ;;  %v2735_v25 = vsub.f32 %v4622_v39, %v2731_v41 }
 0x48f   : > { %v4764_v0 = vpop.eup %3990  ;;  %1680 = vadd.xlane.f32.xlu1 %v1679_v42  ;;  %v2498_v63 = vsel %vm807_vm9, %v4760_v17, 0.0  ;;  %4000 = vpow2.f32 %v2368_v43  ;;  %v2614_v15 = vmul.f32 1.442695, %v2612_v23 }
 0x490   : > { %2499 = vadd.xlane.f32.xlu0 %v2498_v63  ;;  %v1880_v10 = vsel %vm803_vm8, %v4764_v0, 0.0  ;;  %v4771_v3 = vpop.eup %3992  ;;  %4002 = vpow2.f32 %v2491_v8  ;;  %v2737_v19 = vmul.f32 1.442695, %v2735_v25 }
 0x491   : > { %v2003_v6 = vsel %vm803_vm8, %v4771_v3, 0.0  ;;  %4004 = vpow2.f32 %v2614_v15  ;;  %v2734_v42 = vpop.xlane.xlu1 %2733 }
 0x492   : > { %4006 = vpow2.f32 %v2737_v19  ;;  %v2736_v35 = vsub.f32 %v4628_v45, %v2734_v42  ;;  %v958_v45 = vsel %vm833_vm7, %v4630_v46, 0 }
 0x493   : > { %1881 = vadd.xlane.f32.xlu1 %v1880_v10 }
 0x494   : > { %v2739_v1 = vmul.f32 1.442695, %v2736_v35 }
 0x496   : > { %v4774_v20 = vpop.eup %3994 }
 0x497   : > { %v4778_v44 = vpop.eup %3996  ;;  %2004 = vadd.xlane.f32.xlu1 %v2003_v6  ;;  %v2621_v21 = vsel %vm807_vm9, %v4774_v20, 0.0 }
 0x498   : > { %2622 = vadd.xlane.f32.xlu0 %v2621_v21  ;;  %v2126_v30 = vsel %vm803_vm8, %v4778_v44, 0.0  ;;  %v4785_v47 = vpop.eup %3998 }
 0x499   : > { %v2249_v24 = vsel %vm803_vm8, %v4785_v47, 0.0  ;;  %v4789_v29 = vpop.eup %4000 }
 0x49a   : > { %v2372_v14 = vsel %vm803_vm8, %v4789_v29, 0.0  ;;  %v4793_v5 = vpop.eup %4002 }
 0x49b   : > { %2127 = vadd.xlane.f32.xlu1 %v2126_v30  ;;  %v2495_v39 = vsel %vm803_vm8, %v4793_v5, 0.0  ;;  %v4797_v31 = vpop.eup %4004 }
 0x49c   : > { %v2618_v33 = vsel %vm803_vm8, %v4797_v31, 0.0  ;;  %v4801_v53 = vpop.eup %4006 }
 0x49d   : > { %v2741_v34 = vsel %vm803_vm8, %v4801_v53, 0.0 }
 0x49f   : > { %2250 = vadd.xlane.f32.xlu1 %v2249_v24 }
 0x4a3   : > { %2373 = vadd.xlane.f32.xlu1 %v2372_v14 }
 0x4a7   : > { %2496 = vadd.xlane.f32.xlu1 %v2495_v39 }
 0x4ab   : > { %2619 = vadd.xlane.f32.xlu1 %v2618_v33 }
 0x4ae   : > { %2260 = vrot.lane.b32.xlu0 %v4381_v2, %s4154_s13 }
 0x4af   : > { %2742 = vadd.xlane.f32.xlu1 %v2741_v34 }
 0x4b3   : > { %v819_v63 = vpop.xlane.xlu0 %818 }
 0x4b4   : > { %4008 = vrcp.f32 %v819_v63  ;;  %v1081_v63 = vsel %vm833_vm7, %v4624_v40, 0  ;;  %v1204_v40 = vsel %vm833_vm7, %v4634_v51, 0 }
 0x4b5   : > { %v822_v43 = vpop.xlane.xlu1 %821 }
 0x4b6   : > { %4010 = vrcp.f32 %v822_v43 }
 0x4bb   : > { %v943_v10 = vpop.xlane.xlu0 %942 }
 0x4bc   : > { %4012 = vrcp.f32 %v943_v10 }
 0x4bd   : > { %4014 = vpow2.f32 %v2739_v1 }
 0x4be   : > { %v4009_v8 = vpop.eup %4008 }
 0x4bf   : > { %v946_v23 = vpop.xlane.xlu1 %945  ;;  %v824_v6 = vmul.f32 %v4009_v8, %v4650_v28 }
 0x4c0   : > { %v4011_v41 = vpop.eup %4010  ;;  %4016 = vrcp.f32 %v946_v23  ;;  %2383 = vrot.lane.b32.xlu1 %v4381_v2, %s4157_s16 }
 0x4c1   : > { %v826_v21 = vmul.f32 %v4011_v41, %v4654_v36  ;;  %v1327_v41 = vsel %vm833_vm7, %v4636_v52, 0 }
 0x4c3   : > { %v1066_v15 = vpop.xlane.xlu0 %1065  ;;  %v827_v25 = vpack.c.bf16 %v826_v21, %v824_v6 }
 0x4c4   : > { %2506 = vrot.lane.b32.xlu1 %v4381_v2, %s4156_s20  ;;  %4018 = vrcp.f32 %v1066_v15 }
 0x4c5   : > { %3585 = vmatmul.mubr.msk.bf16.vlgmr.msra.gmra.mrb[4].mxu0 %vm803_vm8, %v827_v25  ;;  %v1069_v30 = vpop.xlane.xlu1 %1068 }
 0x4c6   : > { %3595 = vmatpush3.bf16.msra.mxu0 %v958_v45  ;;  %4020 = vrcp.f32 %v1069_v30  ;;  %3596 = vmatprep.mubr.msk.bf16.mxu0 %vm4136_vm4, %v4135_v57  ;;  %v4013_v28 = vpop.eup %4012 }
 0x4c7   : > { %3606 = vmatprep.subr.bf16.mxu0 %v4135_v57  ;;  %v4822_v36 = vpop.eup %4014  ;;  %v948_v46 = vmul.f32 %v4013_v28, %v4660_v48 }
 0x4c8   : > { %2629 = vrot.lane.b32.xlu1 %v4381_v2, %s4159_s12  ;;  %v2744_v39 = vsel %vm807_vm9, %v4822_v36, 0.0  ;;  %s5128_s12 = scalar_lea.vmem %s5109_s9, %s4257_s26 }
 0x4ca   : > { %v4017_v19 = vpop.eup %4016 }
 0x4cb   : > { %v950_v24 = vmul.f32 %v4017_v19, %v4665_v7  ;;  %v1189_v14 = vpop.xlane.xlu0 %1188 }
 0x4cc   : > { %2752 = vrot.lane.b32.xlu1 %v4381_v2, %s4158_s24  ;;  %4022 = vrcp.f32 %v1189_v14  ;;  %v1573_v14 = vsel %vm833_vm7, %v4640_v58, 0 }
 0x4cd   : > { %2745 = vadd.xlane.f32.xlu0 %v2744_v39  ;;  %v1192_v33 = vpop.xlane.xlu1 %1191  ;;  %v951_v34 = vpack.c.bf16 %v950_v24, %v948_v46 }
 0x4ce   : > { %4024 = vrcp.f32 %v1192_v33  ;;  %v4019_v42 = vpop.eup %4018 }
 0x4cf   : > { %3597 = vmatmul.mubr.msk.bf16.vlgmr.msra.gmra.mrb[8].mxu0 %vm803_vm8, %v951_v34  ;;  %v1071_v7 = vmul.f32 %v4019_v42, %v4670_v18  ;;  %v4860_v25 = vpop.permute.xlu0 %2014  ;;  %v1696_v42 = vsel %vm833_vm7, %v4642_v61, 0 }
 0x4d0   : > { %v4021_v48 = vpop.eup %4020  ;;  %3607 = vmatpush3.bf16.msra.mxu0 %v1081_v63  ;;  %3608 = vmatprep.mubr.msk.bf16.mxu0 %vm4136_vm4, %v4135_v57 }
 0x4d1   : > { %v1073_v2 = vmul.f32 %v4021_v48, %v4674_v22  ;;  %3618 = vmatprep.subr.bf16.mxu0 %v4135_v57 }
 0x4d3   : > { %v1312_v43 = vpop.xlane.xlu1 %1311  ;;  %v1074_v35 = vpack.c.bf16 %v1073_v2, %v1071_v7 }
 0x4d4   : > { %4026 = vrcp.f32 %v1312_v43 }
 0x4d6   : > { %v4023_v1 = vpop.eup %4022 }
 0x4d7   : > { %3609 = vmatmul.mubr.msk.bf16.vlgmr.msra.gmra.mrb[12].mxu0 %vm803_vm8, %v1074_v35  ;;  %v1315_v10 = vpop.xlane.xlu1 %1314  ;;  %v1194_v18 = vmul.f32 %v4023_v1, %v4680_v56  ;;  %v1450_v56 = vsel %vm833_vm7, %v4638_v55, 0 }
 0x4d8   : > { %v4025_v8 = vpop.eup %4024  ;;  %3619 = vmatpush3.bf16.msra.mxu0 %v1204_v40  ;;  %4028 = vrcp.f32 %v1315_v10  ;;  %3620 = vmatprep.mubr.msk.bf16.mxu0 %vm4136_vm4, %v4135_v57 }
 0x4d9   : > { %v1196_v22 = vmul.f32 %v4025_v8, %v4684_v60  ;;  %3630 = vmatprep.subr.bf16.mxu0 %v4135_v57 }
 0x4db   : > { %v1197_v23 = vpack.c.bf16 %v1196_v22, %v1194_v18  ;;  %v1897_v18 = vsel %vm833_vm7, %v4644_v62, 0  ;;  %v2020_v62 = vsel %vm833_vm7, %v4860_v25, 0 }
 0x4dd   : > { %v1438_v52 = vpop.xlane.xlu1 %1437 }
 0x4de   : > { %v4027_v51 = vpop.eup %4026  ;;  %4030 = vrcp.f32 %v1438_v52 }
 0x4df   : > { %3621 = vmatmul.mubr.msk.bf16.vlgmr.msra.gmra.mrb[16].mxu0 %vm803_vm8, %v1197_v23  ;;  %v1317_v60 = vmul.f32 %v4027_v51, %v4689_v49 }
 0x4e0   : > { %3631 = vmatpush3.bf16.msra.mxu0 %v1327_v41  ;;  %3632 = vmatprep.mubr.msk.bf16.mxu0 %vm4136_vm4, %v4135_v57 }
 0x4e1   : > { %3642 = vmatprep.subr.bf16.mxu0 %v4135_v57 }
 0x4e2   : > { %v4029_v6 = vpop.eup %4028 }
 0x4e3   : > { %v1319_v21 = vmul.f32 %v4029_v6, %v4693_v4  ;;  %v1558_v45 = vpop.xlane.xlu1 %1557 }
 0x4e5   : > { %v1320_v15 = vpack.c.bf16 %v1319_v21, %v1317_v60 }
 0x4e7   : > { %3633 = vmatmul.mubr.msk.bf16.vlgmr.msra.gmra.mrb[20].mxu0 %vm803_vm8, %v1320_v15  ;;  %v1561_v4 = vpop.xlane.xlu1 %1560 }
 0x4e8   : > { %3643 = vmatpush3.bf16.msra.mxu0 %v1450_v56  ;;  %3644 = vmatprep.mubr.msk.bf16.mxu0 %vm4136_vm4, %v4135_v57  ;;  %v4031_v30 = vpop.eup %4030 }
 0x4e9   : > { %3654 = vmatprep.subr.bf16.mxu0 %v4135_v57  ;;  %v1442_v28 = vmul.f32 %v4031_v30, %v4699_v9 }
 0x4eb   : > { %v2138_v63 = vpop.permute.xlu1 %2137 }
 0x500   : > { %v1435_v49 = vpop.xlane.xlu0 %1434 }
 0x501   : > { %4032 = vrcp.f32 %v1435_v49 }
 0x502   : > { %4034 = vrcp.f32 %v1561_v4  ;;  %v2143_v4 = vsel %vm833_vm7, %v2138_v63, 0 }
 0x503   : > { %4036 = vrcp.f32 %v1558_v45 }
 0x504   : > { %v1684_v34 = vpop.xlane.xlu0 %1683 }
 0x505   : > { %4038 = vrcp.f32 %v1684_v34 }
 0x508   : > { %v1885_v58 = vpop.xlane.xlu0 %1884 }
 0x50b   : > { %v4033_v55 = vpop.eup %4032 }
 0x50c   : > { %v1440_v19 = vmul.f32 %v4033_v55, %v4720_v13  ;;  %v4035_v24 = vpop.eup %4034  ;;  %v2008_v48 = vpop.xlane.xlu0 %2007 }
 0x50d   : > { %v4037_v39 = vpop.eup %4036  ;;  %v1565_v33 = vmul.f32 %v4035_v24, %v4709_v32 }
 0x50e   : > { %v1443_v46 = vpack.c.bf16 %v1442_v28, %v1440_v19  ;;  %v1563_v9 = vmul.f32 %v4037_v39, %v4703_v27 }
 0x50f   : > { %v4039_v7 = vpop.eup %4038 }
 0x510   : > { %3645 = vmatmul.mubr.msk.bf16.vlgmr.msra.gmra.mrb[24].mxu0 %vm803_vm8, %v1443_v46  ;;  %v1566_v13 = vpack.c.bf16 %v1565_v33, %v1563_v9  ;;  %v2131_v61 = vpop.xlane.xlu0 %2130  ;;  %v1688_v35 = vmul.f32 %v4039_v7, %v4725_v26 }
 0x511   : > { %3655 = vmatpush3.bf16.msra.mxu0 %v1573_v14  ;;  %3656 = vmatprep.mubr.msk.bf16.mxu0 %vm4136_vm4, %v4135_v57 }
 0x512   : > { %3666 = vmatprep.subr.bf16.mxu0 %v4135_v57 }
 0x514   : > { %v2254_v22 = vpop.xlane.xlu0 %2253 }
 0x518   : > { %3657 = vmatmul.mubr.msk.bf16.vlgmr.msra.gmra.mrb[28].mxu0 %vm803_vm8, %v1566_v13  ;;  %v2377_v51 = vpop.xlane.xlu0 %2376 }
 0x519   : > { %3667 = vmatpush3.bf16.msra.mxu0 %v1696_v42  ;;  %3668 = vmatprep.mubr.msk.bf16.mxu0 %vm4136_vm4, %v4135_v57 }
 0x51a   : > { %3678 = vmatprep.subr.bf16.mxu0 %v4135_v57 }
 0x51c   : > { %v1681_v32 = vpop.xlane.xlu1 %1680 }
 0x51d   : > { %4040 = vrcp.f32 %v1681_v32 }
 0x520   : > { %v1882_v2 = vpop.xlane.xlu1 %1881 }
 0x521   : > { %4042 = vrcp.f32 %v1882_v2 }
 0x522   : > { %4044 = vrcp.f32 %v1885_v58 }
 0x524   : > { %v2005_v27 = vpop.xlane.xlu1 %2004 }
 0x525   : > { %4046 = vrcp.f32 %v2005_v27 }
 0x526   : > { %4048 = vrcp.f32 %v2008_v48 }
 0x527   : > { %v4041_v43 = vpop.eup %4040 }
 0x528   : > { %v1686_v1 = vmul.f32 %v4041_v43, %v4757_v54  ;;  %v2128_v40 = vpop.xlane.xlu1 %2127 }
 0x529   : > { %4050 = vrcp.f32 %v2128_v40 }
 0x52a   : > { %v1689_v10 = vpack.c.bf16 %v1688_v35, %v1686_v1  ;;  %4052 = vrcp.f32 %v2131_v61 }
 0x52b   : > { %v4043_v8 = vpop.eup %4042 }
 0x52c   : > { %3669 = vmatmul.mubr.msk.bf16.vlgmr.msra.gmra.mrb[32].mxu0 %vm803_vm8, %v1689_v10  ;;  %v2251_v23 = vpop.xlane.xlu1 %2250  ;;  %v4045_v41 = vpop.eup %4044  ;;  %v1887_v26 = vmul.f32 %v4043_v8, %v4764_v0 }
 0x52d   : > { %3679 = vmatpush3.bf16.msra.mxu0 %v1897_v18  ;;  %3680 = vmatprep.mubr.msk.bf16.mxu0 %vm4136_vm4, %v4135_v57  ;;  %v1889_v54 = vmul.f32 %v4045_v41, %v4729_v59  ;;  %v2500_v59 = vpop.xlane.xlu0 %2499  ;;  %4054 = vrcp.f32 %v2251_v23 }
 0x52e   : > { %3690 = vmatprep.subr.bf16.mxu0 %v4135_v57  ;;  %4056 = vrcp.f32 %v2254_v22 }
 0x52f   : > { %v1890_v60 = vpack.c.bf16 %v1889_v54, %v1887_v26  ;;  %v4047_v21 = vpop.eup %4046 }
 0x530   : > { %v2374_v6 = vpop.xlane.xlu1 %2373  ;;  %v4049_v15 = vpop.eup %4048  ;;  %v2010_v0 = vmul.f32 %v4047_v21, %v4771_v3 }
 0x531   : > { %v2012_v52 = vmul.f32 %v4049_v15, %v4735_v37  ;;  %v2623_v25 = vpop.xlane.xlu0 %2622  ;;  %4058 = vrcp.f32 %v2374_v6 }
 0x532   : > { %4060 = vrcp.f32 %v2377_v51 }
 0x533   : > { %v2013_v45 = vpack.c.bf16 %v2012_v52, %v2010_v0  ;;  %v4051_v49 = vpop.eup %4050 }
 0x534   : > { %3681 = vmatmul.mubr.msk.bf16.vlgmr.msra.gmra.mrb[36].mxu0 %vm803_vm8, %v1890_v60  ;;  %v2497_v56 = vpop.xlane.xlu1 %2496  ;;  %v4053_v30 = vpop.eup %4052  ;;  %v2133_v3 = vmul.f32 %v4051_v49, %v4778_v44 }
 0x535   : > { %3691 = vmatpush3.bf16.msra.mxu0 %v2020_v62  ;;  %3692 = vmatprep.mubr.msk.bf16.mxu0 %vm4136_vm4, %v4135_v57  ;;  %v2135_v37 = vmul.f32 %v4053_v30, %v4740_v16  ;;  %v2261_v28 = vpop.permute.xlu0 %2260  ;;  %4062 = vrcp.f32 %v2497_v56 }
 0x536   : > { %3702 = vmatprep.subr.bf16.mxu0 %v4135_v57  ;;  %v2266_v14 = vsel %vm833_vm7, %v2261_v28, 0  ;;  %4064 = vrcp.f32 %v2500_v59 }
 0x537   : > { %v2136_v19 = vpack.c.bf16 %v2135_v37, %v2133_v3  ;;  %v4055_v46 = vpop.eup %4054 }
 0x538   : > { %v2620_v55 = vpop.xlane.xlu1 %2619  ;;  %v4057_v39 = vpop.eup %4056  ;;  %v2256_v44 = vmul.f32 %v4055_v46, %v4785_v47 }
 0x539   : > { %v2258_v16 = vmul.f32 %v4057_v39, %v4746_v38  ;;  %4066 = vrcp.f32 %v2620_v55 }
 0x53a   : > { %4068 = vrcp.f32 %v2623_v25 }
 0x53b   : > { %v2259_v34 = vpack.c.bf16 %v2258_v16, %v2256_v44  ;;  %v4059_v9 = vpop.eup %4058 }
 0x53c   : > { %3693 = vmatmul.mubr.msk.bf16.vlgmr.msra.gmra.mrb[40].mxu0 %vm803_vm8, %v2013_v45  ;;  %v2743_v24 = vpop.xlane.xlu1 %2742  ;;  %v4061_v42 = vpop.eup %4060  ;;  %v2379_v47 = vmul.f32 %v4059_v9, %v4789_v29 }
 0x53d   : > { %3703 = vmatpush3.bf16.msra.mxu0 %v2143_v4  ;;  %3704 = vmatprep.mubr.msk.bf16.mxu0 %vm4136_vm4, %v4135_v57  ;;  %v2381_v38 = vmul.f32 %v4061_v42, %v4751_v50  ;;  %4070 = vrcp.f32 %v2743_v24 }
 0x53e   : > { %3714 = vmatprep.subr.bf16.mxu0 %v4135_v57 }
 0x53f   : > { %v2382_v58 = vpack.c.bf16 %v2381_v38, %v2379_v47  ;;  %v4063_v32 = vpop.eup %4062 }
 0x540   : > { %v2384_v33 = vpop.permute.xlu1 %2383  ;;  %v4065_v2 = vpop.eup %4064  ;;  %v2502_v29 = vmul.f32 %v4063_v32, %v4793_v5 }
 0x541   : > { %v2389_v13 = vsel %vm833_vm7, %v2384_v33, 0  ;;  %v2504_v50 = vmul.f32 %v4065_v2, %v4760_v17 }
 0x543   : > { %v2505_v61 = vpack.c.bf16 %v2504_v50, %v2502_v29  ;;  %v4067_v43 = vpop.eup %4066 }
 0x544   : > { %3705 = vmatmul.mubr.msk.bf16.vlgmr.msra.gmra.mrb[44].mxu0 %vm803_vm8, %v2136_v19  ;;  %v2507_v63 = vpop.permute.xlu1 %2506  ;;  %v4069_v1 = vpop.eup %4068  ;;  %v2625_v5 = vmul.f32 %v4067_v43, %v4797_v31 }
 0x545   : > { %3715 = vmatpush3.bf16.msra.mxu0 %v2266_v14  ;;  %3716 = vmatprep.mubr.msk.bf16.mxu0 %vm4136_vm4, %v4135_v57  ;;  %v2512_v48 = vsel %vm833_vm7, %v2507_v63, 0  ;;  %v2627_v17 = vmul.f32 %v4069_v1, %v4774_v20 }
 0x546   : > { %3726 = vmatprep.subr.bf16.mxu0 %v4135_v57 }
 0x547   : > { %v2628_v10 = vpack.c.bf16 %v2627_v17, %v2625_v5  ;;  %v4071_v8 = vpop.eup %4070 }
 0x548   : > { %v2630_v27 = vpop.permute.xlu1 %2629  ;;  %v2748_v31 = vmul.f32 %v4071_v8, %v4801_v53 }
 0x549   : > { %v2635_v35 = vsel %vm833_vm7, %v2630_v27, 0 }
 0x54c   : > { %3717 = vmatmul.mubr.msk.bf16.vlgmr.msra.gmra.mrb[48].mxu0 %vm803_vm8, %v2259_v34  ;;  %v2753_v40 = vpop.permute.xlu1 %2752 }
 0x54d   : > { %3727 = vmatpush3.bf16.msra.mxu0 %v2389_v13  ;;  %3728 = vmatprep.mubr.msk.bf16.mxu0 %vm4136_vm4, %v4135_v57  ;;  %v2758_v22 = vsel %vm833_vm7, %v2753_v40, 0 }
 0x54e   : > { %3738 = vmatprep.subr.bf16.mxu0 %v4135_v57 }
 0x554   : > { %3729 = vmatmul.mubr.msk.bf16.vlgmr.msra.gmra.mrb[52].mxu0 %vm803_vm8, %v2382_v58 }
 0x555   : > { %3739 = vmatpush3.bf16.msra.mxu0 %v2512_v48  ;;  %3740 = vmatprep.mubr.msk.bf16.mxu0 %vm4136_vm4, %v4135_v57 }
 0x556   : > { %3750 = vmatprep.subr.bf16.mxu0 %v4135_v57 }
 0x55a   : > { %v2746_v7 = vpop.xlane.xlu0 %2745 }
 0x55b   : > { %4072 = vrcp.f32 %v2746_v7 }
 0x55c   : > { %3741 = vmatmul.mubr.msk.bf16.vlgmr.msra.gmra.mrb[56].mxu0 %vm803_vm8, %v2505_v61 }
 0x55d   : > { %3751 = vmatpush3.bf16.msra.mxu0 %v2635_v35  ;;  %3752 = vmatprep.mubr.msk.bf16.mxu0 %vm4136_vm4, %v4135_v57 }
 0x55e   : > { %3762 = vmatprep.subr.bf16.mxu0 %v4135_v57 }
 0x564   : > { %3753 = vmatmul.mubr.msk.bf16.vlgmr.msra.gmra.mrb[60].mxu0 %vm803_vm8, %v2628_v10 }
 0x565   : > { %v4073_v18 = vpop.eup %4072  ;;  %3763 = vmatpush3.bf16.msra.mxu0 %v2758_v22  ;;  %3764 = vmatprep.mubr.msk.bf16.mxu0 %vm4136_vm4, %v4135_v57 }
 0x566   : > { %v2750_v23 = vmul.f32 %v4073_v18, %v4822_v36 }
 0x568   : > { %v2751_v41 = vpack.c.bf16 %v2750_v23, %v2748_v31 }
 0x56c   : > { %3765 = vmatmul.mubr.msk.bf16.vlgmr.msra.gmra.mrb[64].mxu0 %vm803_vm8, %v2751_v41 }
 0x598   : > { %v4938_v20 = vpop.f32.mrb[4].mxu0 }
 0x599   : > { %v3586_v26 = vpop.f32.mrb[5].mxu0 }
 0x59a   : > { %v4940_v54 = vpop.f32.mrb[6].mxu0 }
 0x59b   : > { %v3587_v51 = vpop.f32.mrb[7].mxu0 }
 0x5a2   : > { %v994_v6 = vpop.f32.mrb[8].mxu0 }
 0x5a3   : > { %v3598_v60 = vpop.f32.mrb[9].mxu0 }
 0x5a4   : > { %v997_v21 = vpop.f32.mrb[10].mxu0 }
 0x5a5   : > { %v3860_v62 = vpack.i.bf16 %v994_v6, %v997_v21  ;;  %v3599_v15 = vpop.f32.mrb[11].mxu0 }
 0x5a7   : > { %3861 = vrot.lane.b32.xlu1 %v3860_v62, %s4160_s19 }
 0x5aa   : > { %v1117_v57 = vpop.f32.mrb[12].mxu0 }
 0x5ab   : > { %v3610_v36 = vpop.f32.mrb[13].mxu0 }
 0x5ac   : > { %v1120_v53 = vpop.f32.mrb[14].mxu0 }
 0x5ad   : > { %v3865_v0 = vpack.i.bf16 %v1117_v57, %v1120_v53  ;;  %v3611_v59 = vpop.f32.mrb[15].mxu0  ;;  %v3932_v53 = vld [vmem:[%s4272_s18] sm:$0xff]  }
 0x5ae   : > { %3768 = vmatprep.subr.bf16.mxu1 %v3932_v53 }
 0x5af   : > { %3866 = vrot.lane.b32.xlu1 %v3865_v0, %s4161_s15  ;;  %3769 = vmatpush3.bf16.msra.mxu1 %v3932_v53 }
 0x5b2   : > { %v1240_v56 = vpop.f32.mrb[16].mxu0 }
 0x5b3   : > { %v3622_v52 = vpop.f32.mrb[17].mxu0 }
 0x5b4   : > { %v1243_v45 = vpop.f32.mrb[18].mxu0 }
 0x5b5   : > { %v3870_v49 = vpack.i.bf16 %v1240_v56, %v1243_v45  ;;  %v3623_v25 = vpop.f32.mrb[19].mxu0  ;;  %v3933_v56 = vld [vmem:[%s4272_s18 + $0x8] sm:$0xff]  }
 0x5b6   : > { %3770 = vmatprep.subr.bf16.mxu1 %v3933_v56 }
 0x5b7   : > { %3871 = vrot.lane.b32.xlu1 %v3870_v49, %s4162_s22  ;;  %3771 = vmatpush3.bf16.msra.mxu1 %v3933_v56 }
 0x5ba   : > { %v1363_v4 = vpop.f32.mrb[20].mxu0 }
 0x5bb   : > { %v3634_v30 = vpop.f32.mrb[21].mxu0 }
 0x5bc   : > { %v1366_v55 = vpop.f32.mrb[22].mxu0 }
 0x5bd   : > { %v3875_v3 = vpack.i.bf16 %v1363_v4, %v1366_v55  ;;  %v3635_v37 = vpop.f32.mrb[23].mxu0 }
 0x5bf   : > { %3876 = vrot.lane.b32.xlu1 %v3875_v3, %s4163_s25 }
 0x5e3   : > { %v1486_v28 = vpop.f32.mrb[24].mxu0 }
 0x5e4   : > { %v3646_v19 = vpop.f32.mrb[25].mxu0 }
 0x5e5   : > { %v1489_v46 = vpop.f32.mrb[26].mxu0 }
 0x5e6   : > { %v3880_v24 = vpack.i.bf16 %v1486_v28, %v1489_v46  ;;  %v3647_v14 = vpop.f32.mrb[27].mxu0 }
 0x5e8   : > { %3881 = vrot.lane.b32.xlu1 %v3880_v24, %s4164_s28 }
 0x5eb   : > { %v1609_v39 = vpop.f32.mrb[28].mxu0 }
 0x5ec   : > { %v3658_v44 = vpop.f32.mrb[29].mxu0 }
 0x5ed   : > { %v1612_v16 = vpop.f32.mrb[30].mxu0 }
 0x5ee   : > { %v3905_v33 = vpack.i.bf16 %v1609_v39, %v1612_v16  ;;  %v3659_v34 = vpop.f32.mrb[31].mxu0 }
 0x5ff   : > { %v1732_v9 = vpop.f32.mrb[32].mxu0 }
 0x600   : > { %v3670_v13 = vpop.f32.mrb[33].mxu0 }
 0x601   : > { %v1735_v42 = vpop.f32.mrb[34].mxu0 }
 0x602   : > { %v3925_v47 = vpack.i.bf16 %v1732_v9, %v1735_v42  ;;  %v3671_v38 = vpop.f32.mrb[35].mxu0 }
 0x607   : > { %v4947_v63 = vpop.f32.mrb[36].mxu0 }
 0x608   : > { %v3682_v58 = vpop.f32.mrb[37].mxu0 }
 0x609   : > { %v4949_v32 = vpop.f32.mrb[38].mxu0 }
 0x60a   : > { %v3683_v48 = vpop.f32.mrb[39].mxu0 }
 0x60f   : > { %v2056_v2 = vpop.f32.mrb[40].mxu0 }
 0x610   : > { %v3694_v29 = vpop.f32.mrb[41].mxu0 }
 0x611   : > { %v2059_v50 = vpop.f32.mrb[42].mxu0 }
 0x612   : > { %v3885_v27 = vpack.i.bf16 %v2059_v50, %v2056_v2  ;;  %v3695_v7 = vpop.f32.mrb[43].mxu0 }
 0x614   : > { %3886 = vrot.lane.b32.xlu0 %v3885_v27, %s4160_s19 }
 0x617   : > { %v2179_v61 = vpop.f32.mrb[44].mxu0 }
 0x618   : > { %v3706_v43 = vpop.f32.mrb[45].mxu0 }
 0x619   : > { %v2182_v35 = vpop.f32.mrb[46].mxu0  ;;  %v3862_v30 = vpop.permute.xlu1 %3861 }
 0x61a   : > { %v3890_v1 = vpack.i.bf16 %v2182_v35, %v2179_v61  ;;  %v3707_v5 = vpop.f32.mrb[47].mxu0  ;;  %v3864_v24 = vunpack.i.h.bf16 %v3862_v30  ;;  %v3863_v14 = vunpack.i.l.bf16 %v3862_v30 }
 0x61c   : > { %3891 = vrot.lane.b32.xlu1 %v3890_v1, %s4161_s15  ;;  %v1795_v34 = vsel %vm755_vm6, %v4938_v20, %v3864_v24  ;;  %v1796_v9 = vsel %vm755_vm6, %v4940_v54, %v3863_v14 }
 0x61f   : > { %v2302_v17 = vpop.f32.mrb[48].mxu0 }
 0x620   : > { %v3718_v40 = vpop.f32.mrb[49].mxu0 }
 0x621   : > { %v2305_v10 = vpop.f32.mrb[50].mxu0  ;;  %v3867_v55 = vpop.permute.xlu1 %3866 }
 0x622   : > { %v3895_v8 = vpack.i.bf16 %v2305_v10, %v2302_v17  ;;  %v3719_v22 = vpop.f32.mrb[51].mxu0  ;;  %v3869_v44 = vunpack.i.h.bf16 %v3867_v55  ;;  %v3868_v16 = vunpack.i.l.bf16 %v3867_v55 }
 0x624   : > { %3896 = vrot.lane.b32.xlu1 %v3895_v8, %s4162_s22  ;;  %v1798_v38 = vsel %vm1797_vm10, %v1795_v34, %v3869_v44  ;;  %v1799_v2 = vsel %vm1797_vm10, %v1796_v9, %v3868_v16  ;;  %v3455_v9 = vld [vmem:[%s5126_s2] ss:$0 sm:$0xff]  ;;  %s5129_s22 = scalar_lea.vmem %s5111_s11, %s4257_s26 }
 0x627   : > { %v2425_v18 = vpop.f32.mrb[52].mxu0 }
 0x628   : > { %v3730_v23 = vpop.f32.mrb[53].mxu0 }
 0x629   : > { %v2428_v31 = vpop.f32.mrb[54].mxu0  ;;  %v3872_v3 = vpop.permute.xlu1 %3871 }
 0x62a   : > { %v3900_v41 = vpack.i.bf16 %v2428_v31, %v2425_v18  ;;  %v3731_v26 = vpop.f32.mrb[55].mxu0  ;;  %v3874_v29 = vunpack.i.h.bf16 %v3872_v3  ;;  %v3873_v61 = vunpack.i.l.bf16 %v3872_v3 }
 0x62c   : > { %3901 = vrot.lane.b32.xlu1 %v3900_v41, %s4163_s25  ;;  %v1801_v56 = vsel %vm803_vm8, %v1799_v2, %v3873_v61  ;;  %v4080_v2 = vld [vmem:[#allocation2] sm:$0xff] }
 0x62f   : > { %v2548_v51 = vpop.f32.mrb[56].mxu0 }
 0x630   : > { %3906 = vrot.lane.b32.xlu1 %v3905_v33, %s4165_s29  ;;  %v3742_v6 = vpop.f32.mrb[57].mxu0 }
 0x631   : > { %v2551_v60 = vpop.f32.mrb[58].mxu0  ;;  %v4958_v37 = vpop.permute.xlu1 %3876 }
 0x632   : > { %v3910_v21 = vpack.i.bf16 %v2551_v60, %v2548_v51  ;;  %v3743_v62 = vpop.f32.mrb[59].mxu0  ;;  %v3879_v22 = vunpack.i.h.bf16 %v4958_v37  ;;  %v3878_v18 = vunpack.i.l.bf16 %v4958_v37 }
 0x634   : > { %3911 = vrot.lane.b32.xlu0 %v3910_v21, %s4164_s28 }
 0x637   : > { %v2671_v15 = vpop.f32.mrb[60].mxu0 }
 0x638   : > { %v3754_v57 = vpop.f32.mrb[61].mxu0 }
 0x639   : > { %v2674_v36 = vpop.f32.mrb[62].mxu0 }
 0x63a   : > { %v3915_v0 = vpack.i.bf16 %v2674_v36, %v2671_v15  ;;  %v3755_v59 = vpop.f32.mrb[63].mxu0 }
 0x63b   : > { %v1800_v59 = vsel %vm803_vm8, %v1798_v38, %v3874_v29 }
 0x63c   : > { %3916 = vrot.lane.b32.xlu0 %v3915_v0, %s4165_s29 }
 0x63f   : > { %v2794_v52 = vpop.f32.mrb[64].mxu0 }
 0x640   : > { %v3766_v45 = vpop.f32.mrb[65].mxu0 }
 0x641   : > { %v2797_v49 = vpop.f32.mrb[66].mxu0 }
 0x642   : > { %v3920_v25 = vpack.i.bf16 %v2797_v49, %v2794_v52  ;;  %v3767_v4 = vpop.f32.mrb[67].mxu0  ;;  %v1803_v49 = vsel %vm1802_vm11, %v1800_v59, %v3879_v22 }
 0x644   : > { %3921 = vrot.lane.b32.xlu0 %v3920_v25, %s4166_s23  ;;  %v1804_v25 = vsel %vm1802_vm11, %v1801_v56, %v3878_v18  ;;  %v3460_v56 = vld [vmem:[%s5127_s14] ss:$0 sm:$0xff] }
 0x648   : > { %3926 = vrot.lane.b32.xlu0 %v3925_v47, %s4166_s23 }
 0x65a   : > { %v4960_v28 = vpop.permute.xlu1 %3881 }
 0x65b   : > { %v3884_v41 = vunpack.i.h.bf16 %v4960_v28 }
 0x65d   : > { %v1806_v3 = vsel %vm1805_vm12, %v1803_v49, %v3884_v41  ;;  %v3934_v41 = vld [vmem:[%s4293_s17] sm:$0xff]  }
 0x65e   : > { %3776 = vmatprep.subr.bf16.mxu0 %v3934_v41 }
 0x65f   : > { %3777 = vmatpush3.bf16.msra.mxu0 %v3934_v41 }
 0x686   : > { %v3887_v46 = vpop.permute.xlu0 %3886 }
 0x687   : > { %v3889_v13 = vunpack.i.h.bf16 %v3887_v46  ;;  %v3888_v42 = vunpack.i.l.bf16 %v3887_v46 }
 0x689   : > { %v2858_v54 = vsel %vm755_vm6, %v4949_v32, %v3889_v13  ;;  %v2857_v35 = vsel %vm755_vm6, %v4947_v63, %v3888_v42  ;;  %v3883_v63 = vunpack.i.l.bf16 %v4960_v28 }
 0x68b   : > { %v1807_v37 = vsel %vm1805_vm12, %v1804_v25, %v3883_v63  ;;  %v3935_v63 = vld [vmem:[%s4293_s17 + $0x8] sm:$0xff]  }
 0x68c   : > { %3778 = vmatprep.subr.bf16.mxu0 %v3935_v63 }
 0x68d   : > { %3779 = vmatpush3.bf16.msra.mxu0 %v3935_v63 }
 0x68e   : > { %v3892_v19 = vpop.permute.xlu1 %3891 }
 0x68f   : > { %v3894_v58 = vunpack.i.h.bf16 %v3892_v19  ;;  %v3893_v48 = vunpack.i.l.bf16 %v3892_v19 }
 0x691   : > { %v2860_v17 = vsel %vm1797_vm10, %v2858_v54, %v3894_v58  ;;  %v2859_v40 = vsel %vm1797_vm10, %v2857_v35, %v3893_v48 }
 0x696   : > { %v3897_v39 = vpop.permute.xlu1 %3896 }
 0x697   : > { %v3899_v50 = vunpack.i.h.bf16 %v3897_v39  ;;  %v3898_v27 = vunpack.i.l.bf16 %v3897_v39 }
 0x699   : > { %v2861_v23 = vsel %vm803_vm8, %v2859_v40, %v3898_v27  ;;  %v2862_v31 = vsel %vm803_vm8, %v2860_v17, %v3899_v50 }
 0x69e   : > { %v3902_v47 = vpop.permute.xlu1 %3901 }
 0x69f   : > { %v3904_v43 = vunpack.i.h.bf16 %v3902_v47  ;;  %v3903_v20 = vunpack.i.l.bf16 %v3902_v47 }
 0x6a1   : > { %v2863_v26 = vsel %vm1802_vm11, %v2861_v23, %v3903_v20  ;;  %v2864_v51 = vsel %vm1802_vm11, %v2862_v31, %v3904_v43 }
 0x6a2   : > { %v3907_v32 = vpop.permute.xlu1 %3906 }
 0x6a3   : > { %v3909_v57 = vunpack.i.h.bf16 %v3907_v32  ;;  %v3908_v36 = vunpack.i.l.bf16 %v3907_v32 }
 0x6a5   : > { %v1809_v46 = vsel %vm1808_vm13, %v1806_v3, %v3909_v57  ;;  %v1810_v24 = vsel %vm1808_vm13, %v1807_v37, %v3908_v36 }
 0x6a6   : > { %v3912_v33 = vpop.permute.xlu0 %3911 }
 0x6a7   : > { %v3914_v1 = vunpack.i.h.bf16 %v3912_v33  ;;  %v3913_v5 = vunpack.i.l.bf16 %v3912_v33 }
 0x6a9   : > { %v2865_v60 = vsel %vm1805_vm12, %v2863_v26, %v3913_v5  ;;  %v2866_v21 = vsel %vm1805_vm12, %v2864_v51, %v3914_v1  ;;  %v3936_v26 = vld [vmem:[%s4307_s30] sm:$0xff]   ;;  %v3937_v51 = vld [vmem:[%s4307_s30 + $0x8] sm:$0xff]  }
 0x6aa   : > { %3784 = vmatprep.subr.bf16.mxu1 %v3936_v26 }
 0x6ae   : > { %v3917_v7 = vpop.permute.xlu0 %3916 }
 0x6af   : > { %v3919_v10 = vunpack.i.h.bf16 %v3917_v7  ;;  %v3918_v8 = vunpack.i.l.bf16 %v3917_v7 }
 0x6b1   : > { %v2867_v53 = vsel %vm1808_vm13, %v2865_v60, %v3918_v8  ;;  %v2868_v0 = vsel %vm1808_vm13, %v2866_v21, %v3919_v10 }
 0x6b6   : > { %v3922_v6 = vpop.permute.xlu0 %3921 }
 0x6b7   : > { %v3924_v62 = vunpack.i.h.bf16 %v3922_v6  ;;  %v3923_v15 = vunpack.i.l.bf16 %v3922_v6 }
 0x6b9   : > { %v2869_v52 = vsel %vm1811_vm14, %v2867_v53, %v3923_v15  ;;  %v2870_v45 = vsel %vm1811_vm14, %v2868_v0, %v3924_v62 }
 0x6ba   : > { %v2873_v4 = vrot.slane %v2869_v52, 4  ;;  %v2874_v30 = vrot.slane %v2870_v45, 4  ;;  %v3927_v55 = vpop.permute.xlu0 %3926 }
 0x6bb   : > { %v3929_v28 = vunpack.i.h.bf16 %v3927_v55  ;;  %v3928_v19 = vunpack.i.l.bf16 %v3927_v55 }
 0x6bc   : > { %v2875_v14 = vsel %vm610_vm3, %v2873_v4, %v2874_v30 }
 0x6bd   : > { %v1812_v39 = vsel %vm1811_vm14, %v1809_v46, %v3929_v28  ;;  %v1813_v44 = vsel %vm1811_vm14, %v1810_v24, %v3928_v19  ;;  %v2880_v34 = vpack.c.bf16 %v2875_v14, %v2875_v14 }
 0x6be   : > { %v2878_v16 = vsel %vm610_vm3, %v1813_v44, %v2873_v4  ;;  %v3461_v4 = vld [vmem:[%s558_s1] ss:$0 sm:$0xff]  ;;  %v3939_v44 = vld [vmem:[%s4307_s30 + $0x18] sm:$0xff]  }
 0x6bf   : > { %v2879_v33 = vpack.c.bf16 %v2878_v16, %v1812_v39  ;;  %v3938_v39 = vld [vmem:[%s4307_s30 + $0x10] sm:$0xff]   ;;  %v3462_v16 = vld [vmem:[%s5128_s12] ss:$0 sm:$0xff] }
 0x6c1   : > { %3772 = vmatprep.mubr.msk.bf16.mxu1 %vm617_vm2, %v2879_v33 }
 0x6c2   : > { %3773 = vmatmul.mubr.msk.bf16.vlgmr.msra.gmra.mrb[64].mxu1 %vm617_vm2, %v2880_v34 }
 0x6c3   : > { %3785 = vmatpush3.bf16.msra.mxu1 %v3936_v26 }
 0x6c4   : > { %3786 = vmatprep.subr.bf16.mxu1 %v3937_v51 }
 0x6c7   : > { %3787 = vmatpush3.bf16.msra.mxu1 %v3937_v51 }
 0x6c8   : > { %3788 = vmatprep.subr.bf16.mxu1 %v3938_v39 }
 0x6cb   : > { %3789 = vmatpush3.bf16.msra.mxu1 %v3938_v39 }
 0x6cc   : > { %3790 = vmatprep.subr.bf16.mxu1 %v3939_v44 }
 0x6cf   : > { %3791 = vmatpush3.bf16.msra.mxu1 %v3939_v44 }
 0x795   : > { %v3774_v13 = vpop.f32.mrb[64].mxu1 }
 0x796   : > { %v2944_v42 = vpop.f32.mrb[65].mxu1  ;;  %v2953_v48 = vadd.f32 %v3774_v13, %v3455_v9 }
 0x797   : > { %v2945_v47 = vadd.f32 %v3455_v9, %v2944_v42  ;;  %v3775_v38 = vpop.f32.mrb[66].mxu1 }
 0x798   : > { %v2947_v58 = vpop.f32.mrb[67].mxu1  ;;  %v5015_v61 = vadd.f32 %v2953_v48, %v4324_v11 }
 0x799   : > { %v5007_v29 = vadd.f32 %v4080_v2, %v2945_v47  ;;  %v2948_v50 = vadd.f32 %v3455_v9, %v2947_v58 }
 0x79a   : > { %v2967_v20 = vsel %vm617_vm2, %v5015_v61, 0.0 }
 0x79b   : > { %v5010_v27 = vadd.f32 %v2948_v50, %v4327_v12  ;;  %v2961_v7 = vsel %vm617_vm2, %v5007_v29, 0.0 }
 0x79c   : > { %2962 = vadd.xlane.f32.xlu1 %v2961_v7 }
 0x79d   : > { %v2964_v43 = vsel %vm617_vm2, %v5010_v27, 0.0 }
 0x79e   : > { %2965 = vadd.xlane.f32.xlu0 %v2964_v43  ;;  %v3467_v43 = vld [vmem:[%s5129_s22] ss:$0 sm:$0xff] }
 0x7a2   : > { %2968 = vadd.xlane.f32.xlu0 %v2967_v20 }
 0x829   : > { %v2963_v54 = vpop.xlane.xlu1 %2962 }
 0x82a   : > { %v2970_v35 = vmul.f32 0.03125, %v2963_v54 }
 0x82b   : > { %v2966_v1 = vpop.xlane.xlu0 %2965 }
 0x82c   : > { %v2973_v12 = vsub.f32 %v5007_v29, %v2970_v35  ;;  %v2971_v5 = vmul.f32 0.03125, %v2966_v1 }
 0x82e   : > { %v2974_v17 = vsub.f32 %v5010_v27, %v2971_v5  ;;  %v2976_v11 = vmul.f32 %v2973_v12, %v2973_v12 }
 0x82f   : > { %v2969_v40 = vpop.xlane.xlu0 %2968 }
 0x830   : > { %v2972_v10 = vmul.f32 0.03125, %v2969_v40  ;;  %v2979_v8 = vsel %vm617_vm2, %v2976_v11, 0.0  ;;  %v2977_v22 = vmul.f32 %v2974_v17, %v2974_v17 }
 0x831   : > { %2980 = vadd.xlane.f32.xlu1 %v2979_v8 }
 0x832   : > { %v2975_v18 = vsub.f32 %v5015_v61, %v2972_v10  ;;  %v2982_v23 = vsel %vm617_vm2, %v2977_v22, 0.0 }
 0x833   : > { %2983 = vadd.xlane.f32.xlu0 %v2982_v23 }
 0x834   : > { %v2978_v31 = vmul.f32 %v2975_v18, %v2975_v18 }
 0x836   : > { %v2985_v32 = vsel %vm617_vm2, %v2978_v31, 0.0 }
 0x837   : > { %2986 = vadd.xlane.f32.xlu1 %v2985_v32 }
 0x8be   : > { %v2981_v6 = vpop.xlane.xlu1 %2980 }
 0x8bf   : > { %v2988_v60 = vmul.f32 0.03125, %v2981_v6 }
 0x8c0   : > { %v2984_v21 = vpop.xlane.xlu0 %2983 }
 0x8c1   : > { %v2991_v62 = vadd.f32 1e-05, %v2988_v60  ;;  %v2989_v15 = vmul.f32 0.03125, %v2984_v21 }
 0x8c3   : > { %4074 = vrsqrt.f32 %v2991_v62  ;;  %v2992_v57 = vadd.f32 1e-05, %v2989_v15 }
 0x8c4   : > { %v2987_v36 = vpop.xlane.xlu1 %2986 }
 0x8c5   : > { %4076 = vrsqrt.f32 %v2992_v57  ;;  %v2990_v53 = vmul.f32 0.03125, %v2987_v36 }
 0x8c7   : > { %v2993_v0 = vadd.f32 1e-05, %v2990_v53 }
 0x8c9   : > { %4078 = vrsqrt.f32 %v2993_v0 }
 0x8cd   : > { %v4075_v59 = vpop.eup %4074 }
 0x8ce   : > { %v2997_v52 = vmul.f32 %v4075_v59, %v2973_v12 }
 0x8cf   : > { %v4077_v45 = vpop.eup %4076 }
 0x8d0   : > { %v2998_v49 = vmul.f32 %v4077_v45, %v2974_v17  ;;  %v3007_v25 = vmul.f32 %v3460_v56, %v2997_v52 }
 0x8d2   : > { %v3008_v30 = vmul.f32 %v3460_v56, %v2998_v49  ;;  %v3017_v37 = vadd.f32 %v3461_v4, %v3007_v25 }
 0x8d3   : > { %v4079_v55 = vpop.eup %4078 }
 0x8d4   : > { %v2999_v3 = vmul.f32 %v4079_v55, %v2975_v18  ;;  %v3018_v28 = vadd.f32 %v3461_v4, %v3008_v30 }
 0x8d6   : > { %v3009_v19 = vmul.f32 %v3460_v56, %v2999_v3  ;;  %v3020_v46 = vpack.c.bf16 %v3018_v28, %v3017_v37 }
 0x8d8   : > { %3780 = vmatprep.mubr.msk.bf16.mxu0 %vm617_vm2, %v3020_v46  ;;  %v3019_v24 = vadd.f32 %v3461_v4, %v3009_v19 }
 0x8da   : > { %v3021_v14 = vpack.c.bf16 %v3019_v24, %v3019_v24 }
 0x8dc   : > { %3781 = vmatmul.mubr.msk.bf16.vlgmr.msra.gmra.mrb[68].mxu0 %vm617_vm2, %v3021_v14 }
 0x9af   : > { %v3782_v33 = vpop.f32.mrb[68].mxu0 }
 0x9b0   : > { %v3094_v34 = vadd.f32 %v3782_v33, %v3462_v16  ;;  %v3085_v9 = vpop.f32.mrb[69].mxu0 }
 0x9b1   : > { %v3086_v13 = vadd.f32 %v3462_v16, %v3085_v9  ;;  %v3783_v42 = vpop.f32.mrb[70].mxu0 }
 0x9b2   : > { %v3088_v47 = vpop.f32.mrb[71].mxu0  ;;  %v3101_v58 = vmax.f32 %v3094_v34, 0.0 }
 0x9b3   : > { %v3089_v38 = vadd.f32 %v3462_v16, %v3088_v47  ;;  %v3099_v48 = vmax.f32 %v3086_v13, 0.0 }
 0x9b4   : > { %v3103_v7 = vpack.c.bf16 %v3101_v58, %v3101_v58 }
 0x9b5   : > { %v3100_v2 = vmax.f32 %v3089_v38, 0.0 }
 0x9b7   : > { %v3102_v50 = vpack.c.bf16 %v3100_v2, %v3099_v48 }
 0x9b9   : > { %3792 = vmatprep.mubr.msk.bf16.mxu1 %vm3143_vm15, %v3102_v50 }
 0x9ba   : > { %3793 = vmatmul.mubr.msk.bf16.vlgmr.msra.gmra.mrb[68].mxu1 %vm3143_vm15, %v3103_v7 }
 0xa8d   : > { %v3794_v20 = vpop.f32.mrb[68].mxu1 }
 0xa8e   : > { %v3193_v54 = vadd.f32 %v3794_v20, %v3467_v43  ;;  %v3184_v35 = vpop.f32.mrb[69].mxu1 }
 0xa8f   : > { %v3185_v1 = vadd.f32 %v3467_v43, %v3184_v35  ;;  %v3795_v12 = vpop.f32.mrb[70].mxu1  ;;  %3207 = sbr.rel (%p3474_p6) target bundleno = 2710 (0xa96), region = 76 }
 0xa90   : > { %v3200_v5 = vadd.f32 %v3193_v54, %v5015_v61  ;;  %v3187_v17 = vpop.f32.mrb[71].mxu1 }
 0xa91   : > { %v3198_v11 = vadd.f32 %v3185_v1, %v5007_v29  ;;  %v3188_v40 = vadd.f32 %v3467_v43, %v3187_v17 }
 0xa93   : > { %3202 = vst.msk [vmem:[#allocation2] sm:$0xff] %vm617_vm2, %v3198_v11  ;;  %v3199_v10 = vadd.f32 %v3188_v40, %v5010_v27 }
 0xa94   : > { %3209 = vst.msk [vmem:[#allocation3 - $0x4] sm:$0xf0] (!%p3474_p6), %vm3208_vm1, %v3198_v11 }
 0xa95   : > { %3204 = vst.msk [vmem:[#allocation2 + $0x8] sm:$0xf] %vm3203_vm0, %v3199_v10  ;;  %3210 = vst.msk [vmem:[#allocation3 + $0x4] sm:$0xf] (!%p3474_p6), %vm3203_vm0, %v3199_v10 }
 0xa96 PF: > { %vm3211_vm3 = vcmask 261124   ;;  %3476 = vst.msk [vmem:[#allocation2 + $0x14] sm:$0xff] %vm617_vm2, %v3200_v5  ;;  %3216 = sbr.rel (%p3474_p6) target bundleno = 2717 (0xa9d), region = 80  ;;  %3218 = vst.msk [vmem:[#allocation3 + $0x8] sm:$0xff] (!%p3474_p6), %vm617_vm2, %v3200_v5 }
 0xa97   : > { %3475 = vst.msk [vmem:[#allocation2 + $0xc] sm:$0xf0] %vm3211_vm3, %v3199_v10 }
 0xa9d PF: > { %s5130_s26 = sld [smem:[#allocation7_spill]]  ;;  %s4167_s21 = smov [#allocation3]  }
 0xa9e   : > { %s3228_s29 = sshll.u32 %s4167_s21, 4  ;;  %s3229_s29 = int_to_ptr.vmem [resolvable:$true] %s3228_s29 }
 0xa9f   : > { %s4081_s23 = scalar_lea.vmem %s3229_s29, 256  ;;  %p4088_p11 = scmp.lt.s32.totalorder %s3229_s29, %s3229_s29 }
 0xaa0   : > { %p4082_p8 = scmp.ne.s32.totalorder %s3229_s29, %s4081_s23  ;;  %p4089_p12 = scmp.lt.s32.totalorder %s4081_s23, %s4081_s23 }
 0xaa2   : > { %p4090_p13 = por %p4089_p12, %p4088_p11 }
 0xaa3   : > { %s5131_s25 = sadd.s32 4294967295, %s5130_s26  }
 0xaa4   : > { %p5064_p7 = scmp.eq.s32.totalorder %s5131_s25, 1 }
 0xaa6   : > { %p4083_p9 = pnand %p4082_p8, %p5064_p7 }
 0xaa8   : > { %p4084_p10 = pneg %p4083_p9 }
 0xaaa   : > { %p4091_p0 = pnand %p4090_p13, %p4084_p10 }
 0xaac   : > { %4094 = shalt.err (!%p4091_p0)
}
 0xaad   : > { %s5133_s2 = sld [smem:[#allocation11_spill]] }
 0xab3   : > { %s4095_s17 = scalar_lea.hbm %s5133_s2, 256 }
 0xab4   : > { %p4096_p1 = scmp.ne.s32.totalorder %s5133_s2, %s4095_s17  ;;  %p4101_p4 = scmp.lt.u32.totalorder %s4095_s17, %s5133_s2 }
 0xab6   : > { %p4097_p2 = pnand %p4096_p1, %p5064_p7 }
 0xab8   : > { %p4098_p3 = pneg %p4097_p2 }
 0xaba   : > { %p4103_p5 = pnand %p4101_p4, %p4098_p3 }
 0xabc   : > { %4106 = shalt.err (!%p4103_p5)
}
 0xabd   : > { %s4168_s1 = smov 128  }
 0xabe   : > { %3797 = dma.vmem_to_hbm [thread:$0]  (%p5064_p7), %s3229_s29, 256, %s5133_s2, [#allocation4], %s4168_s1, %s4168_s1, %s4161_s15  }
 0xabf   : > { %4120 = dma.done.wait (%p5064_p7), [#allocation4], 256  }
 0xac0   : > { %4122 = vsyncadd (%p5064_p7), [#allocation4], 4294967040 }
 0xac1 PF: > { %s5134_s30 = sld [smem:[#allocation7_spill]]  ;;  %s5135_s21 = sld [smem:[#allocation6_spill]] }
 0xac2   : > { %s5136_s22 = sld [smem:[#allocation8_spill]] }
 0xac7   : > { %s23_s23 = sadd.s32 1, %s5134_s30  }
 0xac8   : > { %p20_p6 = scmp.ge.s32.totalorder %s23_s23, 4  }
 0xaca   :  { %22 = sbr.rel (!%p20_p6) target bundleno = 6 (0x6), region = 145 }
 0xad1   :  { %3244 = vsyncpa [#allocation4], 1 }
 0xad2   :  { %3246 = vsyncpa [#allocation4 + $0x1], 1 }

</bundles_post_ra>
